<compile_context>
chip_gen: v7x
topology: tpu7x:2x2x1
jax: 0.10.0
libtpu: 0.0.40
codegen_flags: <defaults>
</compile_context>

<pallas_src>
import functools

import numpy as np
import jax
import jax.numpy as jnp
from jax.experimental import pallas as pl
from jax.experimental.pallas import tpu as pltpu


def _round_up(x, m):
    return ((x + m - 1) // m) * m


def _score_loss_kernel(cls_ref, reg_ref, aux_ref, out_ref, *,
                       num_mods, num_preds, inv_mgn):
    M = num_mods
    P = num_preds

    cls = cls_ref[...]                                      # [M, TN] f32

    gx = aux_ref[0 * P:1 * P, :].astype(jnp.float32)        # [P, TN]
    gy = aux_ref[1 * P:2 * P, :].astype(jnp.float32)        # [P, TN]
    has = aux_ref[2 * P:3 * P, :].astype(jnp.float32)       # [P, TN] exact 0/1

    # last = has + 0.1 * arange(P) / P  (time on sublanes; ramp stays f32 so the
    # equality-based one-hot below remains exact even with bf16 streaming).
    t = jax.lax.broadcasted_iota(jnp.int32, has.shape, 0).astype(jnp.float32)
    last = has + (0.1 / float(P)) * t                       # [P, TN]

    max_last = jnp.max(last, axis=0, keepdims=True)         # [1, TN]
    onehot = (last == max_last).astype(jnp.float32)         # [P, TN] exact one-hot
    mask = (max_last > 1.0).astype(jnp.float32)             # [1, TN]

    # gt position at the last valid timestep
    gl_x = jnp.sum(gx * onehot, axis=0, keepdims=True)      # [1, TN]
    gl_y = jnp.sum(gy * onehot, axis=0, keepdims=True)      # [1, TN]

    # Per-mode gather + L2 distance.  The static loop over the tiny mode axis
    # keeps only one [P, TN] f32 temporary pair live at a time (VMEM headroom
    # for larger lane tiles); each product is consumed by its own reduction.
    zacc = jnp.sum(cls, axis=0, keepdims=True)              # [1, TN] 0*sum NaN prop
    dist_rows = []
    for j in range(M):
        rx = reg_ref[j * P:(j + 1) * P, :].astype(jnp.float32)            # [P, TN]
        ry = reg_ref[(M + j) * P:(M + j + 1) * P, :].astype(jnp.float32)  # [P, TN]
        ep_x = jnp.sum(rx * onehot, axis=0, keepdims=True)                # [1, TN]
        ep_y = jnp.sum(ry * onehot, axis=0, keepdims=True)                # [1, TN]
        dx = ep_x - gl_x
        dy = ep_y - gl_y
        dist_rows.append(jnp.sqrt(dx * dx + dy * dy))                     # [1, TN]
        zacc = zacc + jnp.sum(rx, axis=0, keepdims=True) \
                    + jnp.sum(ry, axis=0, keepdims=True)
    dist = jnp.concatenate(dist_rows, axis=0)               # [M, TN]

    # gt_score = softmax(-dist / mgn) over the mode axis; 1/mgn folded into a
    # constant multiply, denominator via pl.reciprocal (EUP path).
    neg = dist * (-inv_mgn)
    nmax = jnp.max(neg, axis=0, keepdims=True)
    e = jnp.exp(neg - nmax)                                  # [M, TN]
    denom = jnp.sum(e, axis=0, keepdims=True)
    gt_score = e * pl.reciprocal(denom, approx=False)        # [M, TN]

    # logsumexp(cls) over modes
    cmax = jnp.max(cls, axis=0, keepdims=True)
    lse = jnp.log(jnp.sum(jnp.exp(cls - cmax), axis=0, keepdims=True)) + cmax

    per_agent = -jnp.sum(cls * gt_score, axis=0, keepdims=True) + lse     # [1, TN]

    # torch's `zero = 0.0*(cls.sum()+reg.sum())`, folded per-agent (summed over
    # all tiles outside the kernel it is exactly 0, or NaN/Inf-propagating).
    out_ref[0:1, :] = per_agent * mask + 0.0 * zacc
    out_ref[1:2, :] = mask


@functools.partial(jax.jit,
                   static_argnames=("num_mods", "num_preds", "inv_mgn",
                                    "max_tile_n", "stream_dtype"))
def _score_loss_impl(cls_list, reg_list, gt_preds, has_preds, *,
                     num_mods, num_preds, inv_mgn, max_tile_n, stream_dtype):
    M, P = num_mods, num_preds

    cls = jnp.concatenate([x.astype(jnp.float32) for x in cls_list], axis=0)  # [N, M]
    N = cls.shape[0]

    # --- tiling: minimal padding, >=2 blocks for larger N (both TensorCores) ---
    N128 = _round_up(max(N, 1), 128)
    num_blocks = pl.cdiv(N128, max_tile_n)
    if N128 >= 1024:
        num_blocks = max(num_blocks, 2)
    TN = _round_up(pl.cdiv(N128, num_blocks), 128)
    N_pad = num_blocks * TN
    pad = N_pad - N

    # cls: [M, N_pad] f32 (tiny)
    cls_t = jnp.transpose(cls, (1, 0))
    if pad:
        cls_t = jnp.pad(cls_t, ((0, 0), (0, pad)))

    # reg: ONE relayout pass -> [2*M*P, N_pad] stream_dtype
    # row order (coord, mode, time); zero tail folded into the concat so the
    # dominant tensor is written exactly once before the kernel reads it.
    planes = [jnp.transpose(r.astype(jnp.float32), (3, 1, 2, 0))
                 .reshape(2 * M * P, -1).astype(stream_dtype)
              for r in reg_list]
    if pad:
        planes.append(jnp.zeros((2 * M * P, pad), stream_dtype))
    reg_t = jnp.concatenate(planes, axis=1)                  # [2*M*P, N_pad]

    # aux: gt_x / gt_y / has stacked on the sublane axis -> one small DMA stream
    aux_rows = _round_up(3 * P, 16)
    gxy = gt_preds.astype(jnp.float32)
    aux = jnp.concatenate([gxy[..., 0], gxy[..., 1],
                           has_preds.astype(jnp.float32)], axis=0)          # [3P, N]
    aux = jnp.pad(aux.astype(stream_dtype), ((0, aux_rows - 3 * P), (0, pad)))

    kernel = functools.partial(_score_loss_kernel,
                               num_mods=M, num_preds=P, inv_mgn=inv_mgn)

    bytes_accessed = (cls_t.size * cls_t.dtype.itemsize
                      + reg_t.size * reg_t.dtype.itemsize
                      + aux.size * aux.dtype.itemsize
                      + 2 * N_pad * 4)
    cost = pl.CostEstimate(flops=int(N_pad) * 1200,
                           transcendentals=int(N_pad) * (2 * M),
                           bytes_accessed=int(bytes_accessed))

    parts = pl.pallas_call(
        kernel,
        out_shape=jax.ShapeDtypeStruct((2, N_pad), jnp.float32),
        grid=(num_blocks,),
        in_specs=[
            pl.BlockSpec((M, TN), lambda i: (0, i)),
            pl.BlockSpec((2 * M * P, TN), lambda i: (0, i)),
            pl.BlockSpec((aux_rows, TN), lambda i: (0, i)),
        ],
        out_specs=pl.BlockSpec((2, TN), lambda i: (0, i)),
        compiler_params=pltpu.CompilerParams(
            dimension_semantics=("parallel",),
            vmem_limit_bytes=32 * 1024 * 1024,
        ),
        cost_estimate=cost,
    )(cls_t, reg_t, aux)

    loss = jnp.sum(parts[0, :])
    num = jnp.sum(parts[1, :].astype(jnp.int32))
    return loss, num


def score_loss(out, gt_preds, has_preds, config, *, max_tile_n=4096,
               stream_dtype=jnp.bfloat16):
    """JAX/Pallas equivalent of ScoreLoss.forward (forward pass only).

    out:       dict with 'cls' (list of [n_i, num_mods]) and
               'reg' (list of [n_i, num_mods, num_preds, 2]).
    gt_preds:  [num_preds, N, 2]
    has_preds: [num_preds, N]  (bool)

    Returns {'cls_loss': f32 scalar (device), 'num_cls': int32 scalar (device)}.
    num_cls stays on device (no host sync); callers may int() it if needed.
    """
    # TODO(synk): add a custom_vjp if this loss must be differentiated; only the
    # forward pass is implemented (no gradient flows through pallas_call).
    loss, num = _score_loss_impl(
        tuple(out["cls"]), tuple(out["reg"]), gt_preds, has_preds,
        num_mods=int(config["num_mods"]),
        num_preds=int(config["num_preds"]),
        inv_mgn=float(1.0 / config["mgn"]),
        max_tile_n=int(max_tile_n),
        stream_dtype=np.dtype(stream_dtype))
    return {"cls_loss": loss, "num_cls": num}


def _score_loss_ref(out, gt_preds, has_preds, config):
    """Pure-JAX reference mirroring the PyTorch code (for verification)."""
    num_preds = config["num_preds"]
    cls = jnp.concatenate(out["cls"], 0).astype(jnp.float32)
    reg = jnp.concatenate(out["reg"], 0).astype(jnp.float32)
    gt = jnp.transpose(gt_preds, (1, 0, 2)).astype(jnp.float32)
    has = jnp.transpose(has_preds, (1, 0)).astype(jnp.float32)

    zero = 0.0 * (cls.sum() + reg.sum())
    last = has + 0.1 * jnp.arange(num_preds, dtype=jnp.float32) / float(num_preds)
    max_last = last.max(1)
    last_idcs = jnp.argmax(last, axis=1)
    mask = (max_last > 1.0).astype(jnp.float32)

    row = jnp.arange(cls.shape[0])
    cls_sum_exp = jax.scipy.special.logsumexp(cls, axis=1)
    ep = reg[row, :, last_idcs]                             # [N, M, 2]
    gl = gt[row, last_idcs]                                 # [N, 2]
    dist = jnp.sqrt(((ep - gl[:, None, :]) ** 2).sum(-1))   # [N, M]
    gt_score = jax.nn.softmax(-dist / config["mgn"], axis=1)
    per = -(cls * gt_score).sum(1) + cls_sum_exp
    loss = (per * mask).sum()
    return zero + loss, int(mask.sum())


if __name__ == "__main__":
    key = jax.random.PRNGKey(0)
    config = {"num_mods": 6, "num_preds": 30, "mgn": 0.2}
    M, P = config["num_mods"], config["num_preds"]

    # two "batches" of actors: 3 + 5 = 8 total
    k1, k2, k3, k4, k5, k6 = jax.random.split(key, 6)
    cls_list = [jax.random.normal(k1, (3, M), jnp.float32),
                jax.random.normal(k2, (5, M), jnp.float32)]
    reg_list = [jax.random.normal(k3, (3, M, P, 2), jnp.float32),
                jax.random.normal(k4, (5, M, P, 2), jnp.float32)]
    N = 8
    gt_preds = jax.random.normal(k5, (P, N, 2), jnp.float32)
    has_preds = jax.random.bernoulli(k6, 0.7, (P, N))
    # make one agent fully invalid so the mask actually drops something
    has_preds = has_preds.at[:, 2].set(False)

    out = {"cls": cls_list, "reg": reg_list}
    res = score_loss(out, gt_preds, has_preds, config)
    jax.block_until_ready(res["cls_loss"])

    # strict check against a reference fed the same bf16-rounded reg / gt
    out_bf = {"cls": cls_list,
              "reg": [r.astype(jnp.bfloat16).astype(jnp.float32) for r in reg_list]}
    gt_bf = gt_preds.astype(jnp.bfloat16).astype(jnp.float32)
    ref_loss, ref_num = _score_loss_ref(out_bf, gt_bf, has_preds, config)
    assert ref_num == int(res["num_cls"]), (ref_num, int(res["num_cls"]))
    assert jnp.allclose(res["cls_loss"], ref_loss, rtol=1e-4, atol=1e-4), (
        res["cls_loss"], ref_loss)

    # loose sanity check against the exact f32 reference (bf16 streaming error)
    ref_loss32, _ = _score_loss_ref(out, gt_preds, has_preds, config)
    assert jnp.allclose(res["cls_loss"], ref_loss32, rtol=1e-1, atol=1.0), (
        res["cls_loss"], ref_loss32)

    print("KERNEL_OK")
</pallas_src>

<mosaic_0001>
module attributes {stable_mosaic.version = 11 : i64} {
  func.func @_score_loss_kernel(%arg0: i32, %arg1: memref<6x128xf32, #tpu.memory_space<vmem>>, %arg2: memref<360x128xbf16, #tpu.memory_space<vmem>>, %arg3: memref<96x128xbf16, #tpu.memory_space<vmem>>, %arg4: memref<2x128xf32, #tpu.memory_space<vmem>>) attributes {dimension_semantics = [#tpu.dimension_semantics<parallel>], iteration_bounds = array<i64: 1>, scalar_prefetch = 0 : i64, scratch_operands = 0 : i64, tpu.core_type = #tpu.core_type<tc>, window_params = [{transform_indices = @transform_0, window_bounds = array<i64: 6, 128>}, {transform_indices = @transform_1, window_bounds = array<i64: 360, 128>}, {transform_indices = @transform_2, window_bounds = array<i64: 96, 128>}, {transform_indices = @transform_3, window_bounds = array<i64: 2, 128>}]} {
    %c0 = arith.constant 0 : index
    %c0_0 = arith.constant 0 : index
    %0 = vector.load %arg1[%c0, %c0_0] : memref<6x128xf32, #tpu.memory_space<vmem>>, vector<6x128xf32>
    %c0_1 = arith.constant 0 : index
    %c0_2 = arith.constant 0 : index
    %1 = vector.load %arg3[%c0_1, %c0_2] : memref<96x128xbf16, #tpu.memory_space<vmem>>, vector<30x128xbf16>
    %2 = arith.extf %1 : vector<30x128xbf16> to vector<30x128xf32>
    %c30 = arith.constant 30 : index
    %c0_3 = arith.constant 0 : index
    %3 = vector.load %arg3[%c30, %c0_3] : memref<96x128xbf16, #tpu.memory_space<vmem>>, vector<30x128xbf16>
    %4 = arith.extf %3 : vector<30x128xbf16> to vector<30x128xf32>
    %c60 = arith.constant 60 : index
    %c0_4 = arith.constant 0 : index
    %5 = vector.load %arg3[%c60, %c0_4] : memref<96x128xbf16, #tpu.memory_space<vmem>>, vector<30x128xbf16>
    %6 = arith.extf %5 : vector<30x128xbf16> to vector<30x128xf32>
    %7 = tpu.iota {dimensions = array<i32: 0>} : vector<30x128xi32>
    %8 = arith.sitofp %7 : vector<30x128xi32> to vector<30x128xf32>
    %cst = arith.constant 0.00333333341 : f32
    %9 = vector.broadcast %cst : f32 to vector<30x128xf32>
    %10 = arith.mulf %9, %8 : vector<30x128xf32>
    %11 = arith.addf %6, %10 : vector<30x128xf32>
    %cst_5 = arith.constant dense<0xFF800000> : vector<128xf32>
    %12 = vector.multi_reduction <maximumf>, %11, %cst_5 [0] : vector<30x128xf32> to vector<128xf32>
    %13 = vector.shape_cast %12 : vector<128xf32> to vector<1x128xf32>
    %14 = vector.broadcast %13 : vector<1x128xf32> to vector<30x128xf32>
    %15 = arith.cmpf oeq, %11, %14 : vector<30x128xf32>
    %16 = arith.extui %15 : vector<30x128xi1> to vector<30x128xi32>
    %17 = arith.sitofp %16 : vector<30x128xi32> to vector<30x128xf32>
    %cst_6 = arith.constant 1.000000e+00 : f32
    %18 = vector.broadcast %cst_6 : f32 to vector<1x128xf32>
    %19 = arith.cmpf ogt, %13, %18 : vector<1x128xf32>
    %20 = arith.extui %19 : vector<1x128xi1> to vector<1x128xi32>
    %21 = arith.sitofp %20 : vector<1x128xi32> to vector<1x128xf32>
    %22 = arith.mulf %2, %17 : vector<30x128xf32>
    %cst_7 = arith.constant dense<0.000000e+00> : vector<128xf32>
    %23 = vector.multi_reduction <add>, %22, %cst_7 [0] : vector<30x128xf32> to vector<128xf32>
    %24 = vector.shape_cast %23 : vector<128xf32> to vector<1x128xf32>
    %25 = arith.mulf %4, %17 : vector<30x128xf32>
    %cst_8 = arith.constant dense<0.000000e+00> : vector<128xf32>
    %26 = vector.multi_reduction <add>, %25, %cst_8 [0] : vector<30x128xf32> to vector<128xf32>
    %27 = vector.shape_cast %26 : vector<128xf32> to vector<1x128xf32>
    %cst_9 = arith.constant dense<0.000000e+00> : vector<128xf32>
    %28 = vector.multi_reduction <add>, %0, %cst_9 [0] : vector<6x128xf32> to vector<128xf32>
    %29 = vector.shape_cast %28 : vector<128xf32> to vector<1x128xf32>
    %c0_10 = arith.constant 0 : index
    %c0_11 = arith.constant 0 : index
    %30 = vector.load %arg2[%c0_10, %c0_11] : memref<360x128xbf16, #tpu.memory_space<vmem>>, vector<30x128xbf16>
    %31 = arith.extf %30 : vector<30x128xbf16> to vector<30x128xf32>
    %c180 = arith.constant 180 : index
    %c0_12 = arith.constant 0 : index
    %32 = vector.load %arg2[%c180, %c0_12] : memref<360x128xbf16, #tpu.memory_space<vmem>>, vector<30x128xbf16>
    %33 = arith.extf %32 : vector<30x128xbf16> to vector<30x128xf32>
    %34 = arith.mulf %31, %17 : vector<30x128xf32>
    %cst_13 = arith.constant dense<0.000000e+00> : vector<128xf32>
    %35 = vector.multi_reduction <add>, %34, %cst_13 [0] : vector<30x128xf32> to vector<128xf32>
    %36 = vector.shape_cast %35 : vector<128xf32> to vector<1x128xf32>
    %37 = arith.mulf %33, %17 : vector<30x128xf32>
    %cst_14 = arith.constant dense<0.000000e+00> : vector<128xf32>
    %38 = vector.multi_reduction <add>, %37, %cst_14 [0] : vector<30x128xf32> to vector<128xf32>
    %39 = vector.shape_cast %38 : vector<128xf32> to vector<1x128xf32>
    %40 = arith.subf %36, %24 : vector<1x128xf32>
    %41 = arith.subf %39, %27 : vector<1x128xf32>
    %42 = arith.mulf %40, %40 : vector<1x128xf32>
    %43 = arith.mulf %41, %41 : vector<1x128xf32>
    %44 = arith.addf %42, %43 : vector<1x128xf32>
    %45 = math.sqrt %44 : vector<1x128xf32>
    %cst_15 = arith.constant dense<0.000000e+00> : vector<128xf32>
    %46 = vector.multi_reduction <add>, %31, %cst_15 [0] : vector<30x128xf32> to vector<128xf32>
    %47 = vector.shape_cast %46 : vector<128xf32> to vector<1x128xf32>
    %48 = arith.addf %29, %47 : vector<1x128xf32>
    %cst_16 = arith.constant dense<0.000000e+00> : vector<128xf32>
    %49 = vector.multi_reduction <add>, %33, %cst_16 [0] : vector<30x128xf32> to vector<128xf32>
    %50 = vector.shape_cast %49 : vector<128xf32> to vector<1x128xf32>
    %51 = arith.addf %48, %50 : vector<1x128xf32>
    %c30_17 = arith.constant 30 : index
    %c0_18 = arith.constant 0 : index
    %52 = vector.load %arg2[%c30_17, %c0_18] : memref<360x128xbf16, #tpu.memory_space<vmem>>, vector<30x128xbf16>
    %53 = arith.extf %52 : vector<30x128xbf16> to vector<30x128xf32>
    %c210 = arith.constant 210 : index
    %c0_19 = arith.constant 0 : index
    %54 = vector.load %arg2[%c210, %c0_19] : memref<360x128xbf16, #tpu.memory_space<vmem>>, vector<30x128xbf16>
    %55 = arith.extf %54 : vector<30x128xbf16> to vector<30x128xf32>
    %56 = arith.mulf %53, %17 : vector<30x128xf32>
    %cst_20 = arith.constant dense<0.000000e+00> : vector<128xf32>
    %57 = vector.multi_reduction <add>, %56, %cst_20 [0] : vector<30x128xf32> to vector<128xf32>
    %58 = vector.shape_cast %57 : vector<128xf32> to vector<1x128xf32>
    %59 = arith.mulf %55, %17 : vector<30x128xf32>
    %cst_21 = arith.constant dense<0.000000e+00> : vector<128xf32>
    %60 = vector.multi_reduction <add>, %59, %cst_21 [0] : vector<30x128xf32> to vector<128xf32>
    %61 = vector.shape_cast %60 : vector<128xf32> to vector<1x128xf32>
    %62 = arith.subf %58, %24 : vector<1x128xf32>
    %63 = arith.subf %61, %27 : vector<1x128xf32>
    %64 = arith.mulf %62, %62 : vector<1x128xf32>
    %65 = arith.mulf %63, %63 : vector<1x128xf32>
    %66 = arith.addf %64, %65 : vector<1x128xf32>
    %67 = math.sqrt %66 : vector<1x128xf32>
    %cst_22 = arith.constant dense<0.000000e+00> : vector<128xf32>
    %68 = vector.multi_reduction <add>, %53, %cst_22 [0] : vector<30x128xf32> to vector<128xf32>
    %69 = vector.shape_cast %68 : vector<128xf32> to vector<1x128xf32>
    %70 = arith.addf %51, %69 : vector<1x128xf32>
    %cst_23 = arith.constant dense<0.000000e+00> : vector<128xf32>
    %71 = vector.multi_reduction <add>, %55, %cst_23 [0] : vector<30x128xf32> to vector<128xf32>
    %72 = vector.shape_cast %71 : vector<128xf32> to vector<1x128xf32>
    %73 = arith.addf %70, %72 : vector<1x128xf32>
    %c60_24 = arith.constant 60 : index
    %c0_25 = arith.constant 0 : index
    %74 = vector.load %arg2[%c60_24, %c0_25] : memref<360x128xbf16, #tpu.memory_space<vmem>>, vector<30x128xbf16>
    %75 = arith.extf %74 : vector<30x128xbf16> to vector<30x128xf32>
    %c240 = arith.constant 240 : index
    %c0_26 = arith.constant 0 : index
    %76 = vector.load %arg2[%c240, %c0_26] : memref<360x128xbf16, #tpu.memory_space<vmem>>, vector<30x128xbf16>
    %77 = arith.extf %76 : vector<30x128xbf16> to vector<30x128xf32>
    %78 = arith.mulf %75, %17 : vector<30x128xf32>
    %cst_27 = arith.constant dense<0.000000e+00> : vector<128xf32>
    %79 = vector.multi_reduction <add>, %78, %cst_27 [0] : vector<30x128xf32> to vector<128xf32>
    %80 = vector.shape_cast %79 : vector<128xf32> to vector<1x128xf32>
    %81 = arith.mulf %77, %17 : vector<30x128xf32>
    %cst_28 = arith.constant dense<0.000000e+00> : vector<128xf32>
    %82 = vector.multi_reduction <add>, %81, %cst_28 [0] : vector<30x128xf32> to vector<128xf32>
    %83 = vector.shape_cast %82 : vector<128xf32> to vector<1x128xf32>
    %84 = arith.subf %80, %24 : vector<1x128xf32>
    %85 = arith.subf %83, %27 : vector<1x128xf32>
    %86 = arith.mulf %84, %84 : vector<1x128xf32>
    %87 = arith.mulf %85, %85 : vector<1x128xf32>
    %88 = arith.addf %86, %87 : vector<1x128xf32>
    %89 = math.sqrt %88 : vector<1x128xf32>
    %cst_29 = arith.constant dense<0.000000e+00> : vector<128xf32>
    %90 = vector.multi_reduction <add>, %75, %cst_29 [0] : vector<30x128xf32> to vector<128xf32>
    %91 = vector.shape_cast %90 : vector<128xf32> to vector<1x128xf32>
    %92 = arith.addf %73, %91 : vector<1x128xf32>
    %cst_30 = arith.constant dense<0.000000e+00> : vector<128xf32>
    %93 = vector.multi_reduction <add>, %77, %cst_30 [0] : vector<30x128xf32> to vector<128xf32>
    %94 = vector.shape_cast %93 : vector<128xf32> to vector<1x128xf32>
    %95 = arith.addf %92, %94 : vector<1x128xf32>
    %c90 = arith.constant 90 : index
    %c0_31 = arith.constant 0 : index
    %96 = vector.load %arg2[%c90, %c0_31] : memref<360x128xbf16, #tpu.memory_space<vmem>>, vector<30x128xbf16>
    %97 = arith.extf %96 : vector<30x128xbf16> to vector<30x128xf32>
    %c270 = arith.constant 270 : index
    %c0_32 = arith.constant 0 : index
    %98 = vector.load %arg2[%c270, %c0_32] : memref<360x128xbf16, #tpu.memory_space<vmem>>, vector<30x128xbf16>
    %99 = arith.extf %98 : vector<30x128xbf16> to vector<30x128xf32>
    %100 = arith.mulf %97, %17 : vector<30x128xf32>
    %cst_33 = arith.constant dense<0.000000e+00> : vector<128xf32>
    %101 = vector.multi_reduction <add>, %100, %cst_33 [0] : vector<30x128xf32> to vector<128xf32>
    %102 = vector.shape_cast %101 : vector<128xf32> to vector<1x128xf32>
    %103 = arith.mulf %99, %17 : vector<30x128xf32>
    %cst_34 = arith.constant dense<0.000000e+00> : vector<128xf32>
    %104 = vector.multi_reduction <add>, %103, %cst_34 [0] : vector<30x128xf32> to vector<128xf32>
    %105 = vector.shape_cast %104 : vector<128xf32> to vector<1x128xf32>
    %106 = arith.subf %102, %24 : vector<1x128xf32>
    %107 = arith.subf %105, %27 : vector<1x128xf32>
    %108 = arith.mulf %106, %106 : vector<1x128xf32>
    %109 = arith.mulf %107, %107 : vector<1x128xf32>
    %110 = arith.addf %108, %109 : vector<1x128xf32>
    %111 = math.sqrt %110 : vector<1x128xf32>
    %cst_35 = arith.constant dense<0.000000e+00> : vector<128xf32>
    %112 = vector.multi_reduction <add>, %97, %cst_35 [0] : vector<30x128xf32> to vector<128xf32>
    %113 = vector.shape_cast %112 : vector<128xf32> to vector<1x128xf32>
    %114 = arith.addf %95, %113 : vector<1x128xf32>
    %cst_36 = arith.constant dense<0.000000e+00> : vector<128xf32>
    %115 = vector.multi_reduction <add>, %99, %cst_36 [0] : vector<30x128xf32> to vector<128xf32>
    %116 = vector.shape_cast %115 : vector<128xf32> to vector<1x128xf32>
    %117 = arith.addf %114, %116 : vector<1x128xf32>
    %c120 = arith.constant 120 : index
    %c0_37 = arith.constant 0 : index
    %118 = vector.load %arg2[%c120, %c0_37] : memref<360x128xbf16, #tpu.memory_space<vmem>>, vector<30x128xbf16>
    %119 = arith.extf %118 : vector<30x128xbf16> to vector<30x128xf32>
    %c300 = arith.constant 300 : index
    %c0_38 = arith.constant 0 : index
    %120 = vector.load %arg2[%c300, %c0_38] : memref<360x128xbf16, #tpu.memory_space<vmem>>, vector<30x128xbf16>
    %121 = arith.extf %120 : vector<30x128xbf16> to vector<30x128xf32>
    %122 = arith.mulf %119, %17 : vector<30x128xf32>
    %cst_39 = arith.constant dense<0.000000e+00> : vector<128xf32>
    %123 = vector.multi_reduction <add>, %122, %cst_39 [0] : vector<30x128xf32> to vector<128xf32>
    %124 = vector.shape_cast %123 : vector<128xf32> to vector<1x128xf32>
    %125 = arith.mulf %121, %17 : vector<30x128xf32>
    %cst_40 = arith.constant dense<0.000000e+00> : vector<128xf32>
    %126 = vector.multi_reduction <add>, %125, %cst_40 [0] : vector<30x128xf32> to vector<128xf32>
    %127 = vector.shape_cast %126 : vector<128xf32> to vector<1x128xf32>
    %128 = arith.subf %124, %24 : vector<1x128xf32>
    %129 = arith.subf %127, %27 : vector<1x128xf32>
    %130 = arith.mulf %128, %128 : vector<1x128xf32>
    %131 = arith.mulf %129, %129 : vector<1x128xf32>
    %132 = arith.addf %130, %131 : vector<1x128xf32>
    %133 = math.sqrt %132 : vector<1x128xf32>
    %cst_41 = arith.constant dense<0.000000e+00> : vector<128xf32>
    %134 = vector.multi_reduction <add>, %119, %cst_41 [0] : vector<30x128xf32> to vector<128xf32>
    %135 = vector.shape_cast %134 : vector<128xf32> to vector<1x128xf32>
    %136 = arith.addf %117, %135 : vector<1x128xf32>
    %cst_42 = arith.constant dense<0.000000e+00> : vector<128xf32>
    %137 = vector.multi_reduction <add>, %121, %cst_42 [0] : vector<30x128xf32> to vector<128xf32>
    %138 = vector.shape_cast %137 : vector<128xf32> to vector<1x128xf32>
    %139 = arith.addf %136, %138 : vector<1x128xf32>
    %c150 = arith.constant 150 : index
    %c0_43 = arith.constant 0 : index
    %140 = vector.load %arg2[%c150, %c0_43] : memref<360x128xbf16, #tpu.memory_space<vmem>>, vector<30x128xbf16>
    %141 = arith.extf %140 : vector<30x128xbf16> to vector<30x128xf32>
    %c330 = arith.constant 330 : index
    %c0_44 = arith.constant 0 : index
    %142 = vector.load %arg2[%c330, %c0_44] : memref<360x128xbf16, #tpu.memory_space<vmem>>, vector<30x128xbf16>
    %143 = arith.extf %142 : vector<30x128xbf16> to vector<30x128xf32>
    %144 = arith.mulf %141, %17 : vector<30x128xf32>
    %cst_45 = arith.constant dense<0.000000e+00> : vector<128xf32>
    %145 = vector.multi_reduction <add>, %144, %cst_45 [0] : vector<30x128xf32> to vector<128xf32>
    %146 = vector.shape_cast %145 : vector<128xf32> to vector<1x128xf32>
    %147 = arith.mulf %143, %17 : vector<30x128xf32>
    %cst_46 = arith.constant dense<0.000000e+00> : vector<128xf32>
    %148 = vector.multi_reduction <add>, %147, %cst_46 [0] : vector<30x128xf32> to vector<128xf32>
    %149 = vector.shape_cast %148 : vector<128xf32> to vector<1x128xf32>
    %150 = arith.subf %146, %24 : vector<1x128xf32>
    %151 = arith.subf %149, %27 : vector<1x128xf32>
    %152 = arith.mulf %150, %150 : vector<1x128xf32>
    %153 = arith.mulf %151, %151 : vector<1x128xf32>
    %154 = arith.addf %152, %153 : vector<1x128xf32>
    %155 = math.sqrt %154 : vector<1x128xf32>
    %cst_47 = arith.constant dense<0.000000e+00> : vector<128xf32>
    %156 = vector.multi_reduction <add>, %141, %cst_47 [0] : vector<30x128xf32> to vector<128xf32>
    %157 = vector.shape_cast %156 : vector<128xf32> to vector<1x128xf32>
    %158 = arith.addf %139, %157 : vector<1x128xf32>
    %cst_48 = arith.constant dense<0.000000e+00> : vector<128xf32>
    %159 = vector.multi_reduction <add>, %143, %cst_48 [0] : vector<30x128xf32> to vector<128xf32>
    %160 = vector.shape_cast %159 : vector<128xf32> to vector<1x128xf32>
    %161 = arith.addf %158, %160 : vector<1x128xf32>
    %162 = tpu.concatenate %45, %67, %89, %111, %133, %155 in 0 : vector<1x128xf32>, vector<1x128xf32>, vector<1x128xf32>, vector<1x128xf32>, vector<1x128xf32>, vector<1x128xf32> -> vector<6x128xf32>
    %cst_49 = arith.constant -5.000000e+00 : f32
    %163 = vector.broadcast %cst_49 : f32 to vector<6x128xf32>
    %164 = arith.mulf %162, %163 : vector<6x128xf32>
    %cst_50 = arith.constant dense<0xFF800000> : vector<128xf32>
    %165 = vector.multi_reduction <maximumf>, %164, %cst_50 [0] : vector<6x128xf32> to vector<128xf32>
    %166 = vector.shape_cast %165 : vector<128xf32> to vector<1x128xf32>
    %167 = vector.broadcast %166 : vector<1x128xf32> to vector<6x128xf32>
    %168 = arith.subf %164, %167 : vector<6x128xf32>
    %169 = math.exp %168 : vector<6x128xf32>
    %cst_51 = arith.constant dense<0.000000e+00> : vector<128xf32>
    %170 = vector.multi_reduction <add>, %169, %cst_51 [0] : vector<6x128xf32> to vector<128xf32>
    %171 = vector.shape_cast %170 : vector<128xf32> to vector<1x128xf32>
    %172 = tpu.reciprocal %171 : vector<1x128xf32> -> vector<1x128xf32>
    %173 = vector.broadcast %172 : vector<1x128xf32> to vector<6x128xf32>
    %174 = arith.mulf %169, %173 : vector<6x128xf32>
    %cst_52 = arith.constant dense<0xFF800000> : vector<128xf32>
    %175 = vector.multi_reduction <maximumf>, %0, %cst_52 [0] : vector<6x128xf32> to vector<128xf32>
    %176 = vector.shape_cast %175 : vector<128xf32> to vector<1x128xf32>
    %177 = vector.broadcast %176 : vector<1x128xf32> to vector<6x128xf32>
    %178 = arith.subf %0, %177 : vector<6x128xf32>
    %179 = math.exp %178 : vector<6x128xf32>
    %cst_53 = arith.constant dense<0.000000e+00> : vector<128xf32>
    %180 = vector.multi_reduction <add>, %179, %cst_53 [0] : vector<6x128xf32> to vector<128xf32>
    %181 = vector.shape_cast %180 : vector<128xf32> to vector<1x128xf32>
    %182 = math.log %181 : vector<1x128xf32>
    %183 = arith.addf %182, %176 : vector<1x128xf32>
    %184 = arith.mulf %0, %174 : vector<6x128xf32>
    %cst_54 = arith.constant dense<0.000000e+00> : vector<128xf32>
    %185 = vector.multi_reduction <add>, %184, %cst_54 [0] : vector<6x128xf32> to vector<128xf32>
    %186 = vector.shape_cast %185 : vector<128xf32> to vector<1x128xf32>
    %cst_55 = arith.constant 0.000000e+00 : f32
    %187 = vector.broadcast %cst_55 : f32 to vector<1x128xf32>
    %188 = arith.subf %187, %186 : vector<1x128xf32>
    %189 = arith.addf %188, %183 : vector<1x128xf32>
    %190 = arith.mulf %189, %21 : vector<1x128xf32>
    %cst_56 = arith.constant 0.000000e+00 : f32
    %191 = vector.broadcast %cst_56 : f32 to vector<1x128xf32>
    %192 = arith.mulf %191, %161 : vector<1x128xf32>
    %193 = arith.addf %190, %192 : vector<1x128xf32>
    %c0_57 = arith.constant 0 : index
    %c0_58 = arith.constant 0 : index
    %194 = vector.load %arg4[%c0_57, %c0_58] : memref<2x128xf32, #tpu.memory_space<vmem>>, vector<1x128xf32>
    tpu.vector_store %arg4[%c0_57, %c0_58], %193 {strides = array<i32>} : memref<2x128xf32, #tpu.memory_space<vmem>>, vector<1x128xf32>,
    %c1 = arith.constant 1 : index
    %c0_59 = arith.constant 0 : index
    %195 = vector.load %arg4[%c1, %c0_59] : memref<2x128xf32, #tpu.memory_space<vmem>>, vector<1x128xf32>
    tpu.vector_store %arg4[%c1, %c0_59], %21 {strides = array<i32>} : memref<2x128xf32, #tpu.memory_space<vmem>>, vector<1x128xf32>,
    return
  }
  func.func @transform_0(%arg0: i32) -> (i32, i32) {
    %c0_i32 = arith.constant 0 : i32
    %c0_i32_0 = arith.constant 0 : i32
    return %c0_i32, %arg0 : i32, i32
  }
  func.func @transform_1(%arg0: i32) -> (i32, i32) {
    %c0_i32 = arith.constant 0 : i32
    %c0_i32_0 = arith.constant 0 : i32
    return %c0_i32, %arg0 : i32, i32
  }
  func.func @transform_2(%arg0: i32) -> (i32, i32) {
    %c0_i32 = arith.constant 0 : i32
    %c0_i32_0 = arith.constant 0 : i32
    return %c0_i32, %arg0 : i32, i32
  }
  func.func @transform_3(%arg0: i32) -> (i32, i32) {
    %c0_i32 = arith.constant 0 : i32
    %c0_i32_0 = arith.constant 0 : i32
    return %c0_i32, %arg0 : i32, i32
  }
}

</mosaic_0001>

<bundles_post_ra>
// kernel: _score_loss_impl.1
= control target key start
LH: loop header
LB: loop body
LE: loop exit
PB: predicated region body
PF: predicated region fallthrough
CT: control target
= control target key end

     0   :  { %v43_v2 = vlaneseq  ;;  %vm60_vm0 = vcmask 1043456   ;;  %vm78_vm1 = vcmask 1047556   ;;  %vm134_vm2 = vcmask 1045504   ;;  %s2074_s0 = inlined_call_operand.vmem [shape: f32[6,128], index: 0, kind: input, shape index: {}]   ;;  %s2075_s2 = inlined_call_operand.vmem [shape: bf16[96,128], index: 2, kind: input, shape index: {}]   ;;  %s2076_s1 = inlined_call_operand.vmem [shape: bf16[360,128], index: 1, kind: input, shape index: {}]   ;;  %s2077_s3 = inlined_call_operand.vmem [shape: f32[2,128], index: 3, kind: output, shape index: {}]  }
   0x1   :  { %v1194_v0 = vld [vmem:[%s2075_s2] sm:$0xff]   ;;  %v1199_v1 = vld [vmem:[%s2075_s2 + $0x8] ss:$16 sps:$4 sm:$0xff]   ;;  %v1205_v4 = vld [vmem:[%s2075_s2 + $0xc] sm:$0x7]  ;;  %vm80_vm3 = vcmask 1041408  }
   0x2   :  { %v1077_v3 = vunpack.c.l.bf16 %v1194_v0  ;;  %v1210_v5 = vld [vmem:[%s2075_s2 + $0x10] sm:$0xff]   ;;  %v14_v6 = vld [vmem:[%s2074_s0] sm:$0x3f]  ;;  %v1078_v7 = vunpack.c.h.bf16 %v1194_v0  ;;  %v21_v8 = vunpack.c.l.bf16 %v1199_v1  ;;  %v22_v9 = vunpack.c.l.bf16 %v1205_v4  ;;  %v33_v11 = vld [vmem:[%s2075_s2 + $0x1c] sm:$0xc] }
   0x3   :  { %v31_v10 = vunpack.c.h.bf16 %v1199_v1  ;;  %v1136_v12 = vld [vmem:[%s2075_s2 + $0x20] sm:$0xff]   ;;  %v1081_v13 = vunpack.c.l.bf16 %v1210_v5  ;;  %v36_v16 = vld [vmem:[%s2075_s2 + $0x28] sm:$0xf]  ;;  %v37_v17 = vld [vmem:[%s2075_s2 + $0x2c] sm:$0x1]  ;;  %v38_v18 = vunpack.c.l.bf16 %v33_v11  ;;  %v44_v22 = vshrl.u32 %v43_v2, 7 }
   0x4   :  { %v1085_v14 = vunpack.c.l.bf16 %v1136_v12  ;;  %v1086_v15 = vunpack.c.h.bf16 %v1136_v12  ;;  %v1235_v19 = vld [vmem:[%s2076_s1] sm:$0xff]   ;;  %v41_v20 = vunpack.c.l.bf16 %v36_v16  ;;  %v42_v21 = vunpack.c.l.bf16 %v37_v17  ;;  %v1240_v23 = vld [vmem:[%s2076_s1 + $0x8] ss:$84 sps:$4 sm:$0xff]   ;;  %v1245_v24 = vld [vmem:[%s2076_s1 + $0xc] sm:$0x7] }
   0x5   :  { %v190_v25 = vsel %vm134_vm2, %v14_v6, 0.0  ;;  %v1089_v26 = vunpack.c.l.bf16 %v1235_v19  ;;  %v1090_v27 = vunpack.c.h.bf16 %v1235_v19  ;;  %v203_v28 = vunpack.c.l.bf16 %v1240_v23  ;;  %v1254_v29 = vld [vmem:[%s2076_s1 + $0x58] sm:$0xc]  ;;  %v1259_v30 = vld [vmem:[%s2076_s1 + $0x60] sm:$0xff]   ;;  %v1264_v35 = vld [vmem:[%s2076_s1 + $0x68] sm:$0x1] }
   0x6   :  { %v45_v31 = vadd.s32 8, %v44_v22  ;;  %v46_v32 = vadd.s32 16, %v44_v22  ;;  %v47_v33 = vadd.s32 24, %v44_v22  ;;  %v48_v34 = vcvt.s32.f32 %v44_v22 }
   0x7   :  { %v191_v36 = vrot.slane %v190_v25, 4  ;;  %v204_v37 = vunpack.c.l.bf16 %v1245_v24  ;;  %v1093_v38 = vunpack.c.l.bf16 %v1259_v30  ;;  %v1094_v39 = vunpack.c.h.bf16 %v1259_v30 }
   0x8   :  { %v49_v40 = vcvt.s32.f32 %v45_v31  ;;  %v50_v41 = vcvt.s32.f32 %v46_v32  ;;  %v51_v42 = vcvt.s32.f32 %v47_v33  ;;  %v52_v43 = vmul.f32 0.0033333334, %v48_v34 }
   0x9   :  { %v192_v44 = vadd.f32 %v191_v36, %v190_v25  ;;  %v210_v45 = vunpack.c.l.bf16 %v1254_v29  ;;  %v211_v46 = vunpack.c.h.bf16 %v1240_v23  ;;  %v214_v47 = vunpack.c.l.bf16 %v1264_v35  ;;  %v1318_v36 = vld [vmem:[%s2076_s1 + $0xc] sm:$0x8] }
   0xa   :  { %v53_v48 = vmul.f32 0.0033333334, %v49_v40  ;;  %v54_v49 = vmul.f32 0.0033333334, %v50_v41  ;;  %v55_v50 = vmul.f32 0.0033333334, %v51_v42  ;;  %v274_v51 = vadd.f32 %v1090_v27, %v1089_v26 }
   0xb   :  { %v61_v52 = vrot.slane %v52_v43, 4  ;;  %v193_v53 = vrot.slane %v192_v44, 2  ;;  %v276_v54 = vsel %vm134_vm2, %v204_v37, 0.0  ;;  %v290_v55 = vrot.slane %v210_v45, 4 }
   0xc   :  { %v62_v56 = vrot.slane %v53_v48, 4  ;;  %v64_v57 = vrot.slane %v54_v49, 4  ;;  %v66_v58 = vrot.slane %v55_v50, 4  ;;  %v275_v59 = vadd.f32 %v274_v51, %v203_v28 }
   0xd   :  { %v1283_v60 = vadd.f32 %v61_v52, %v38_v18  ;;  %v194_v61 = vadd.f32 %v193_v53, %v192_v44  ;;  %v291_v62 = vrot.slane %v211_v46, 4  ;;  %v293_v63 = vrot.slane %v1093_v38, 4  ;;  %v1327_v44 = vld [vmem:[%s2076_s1 + $0x1c] sm:$0x3] }
   0xe   :  { %v63_v2 = vsel %vm60_vm0, %v61_v52, %v62_v56  ;;  %v65_v6 = vsel %vm60_vm0, %v62_v56, %v64_v57  ;;  %v67_v11 = vsel %vm60_vm0, %v64_v57, %v66_v58  ;;  %v1292_v12 = vadd.f32 %v66_v58, %v42_v21  ;;  %v1308_v21 = vld [vmem:[%s2076_s1 + $0x10] sm:$0xff]   ;;  %v1342_v56 = vld [vmem:[%s2076_s1 + $0x18] ss:$84 sps:$4 sm:$0xff]   ;;  %v1348_v58 = vld [vmem:[%s2076_s1 + $0x68] sm:$0xe] }
   0xf   :  { %v1294_v16 = vadd.f32 %v1085_v14, %v63_v2  ;;  %v1296_v17 = vadd.f32 %v1086_v15, %v65_v6  ;;  %v1298_v18 = vadd.f32 %v67_v11, %v41_v20  ;;  %v79_v22 = vsel %vm78_vm1, %v1283_v60, -inf  ;;  %v1336_v52 = vld [vmem:[%s2076_s1 + $0x70] sm:$0xff]  }
  0x10   :  { %v81_v25 = vsel %vm80_vm3, %v1292_v12, -inf  ;;  %v195_v31 = vrot.slane %v194_v61, 1  ;;  %v277_v32 = vadd.f32 %v276_v54, %v275_v59  ;;  %v292_v33 = vsel %vm60_vm0, %v290_v55, %v291_v62 }
  0x11   :  { %v82_v14 = vmax.f32 %v79_v22, %v81_v25  ;;  %v84_v15 = vmax.f32 %v1296_v17, %v1298_v18  ;;  %v294_v20 = vsel %vm60_vm0, %v291_v62, %v293_v63  ;;  %v295_v34 = vrot.slane %v1094_v39, 4 }
  0x12   :  { %v1320_v40 = vadd.f32 %v195_v31, %v194_v61  ;;  %v278_v41 = vrot.slane %v277_v32, 4  ;;  %v297_v42 = vrot.slane %v214_v47, 4  ;;  %v303_v43 = vadd.f32 %v294_v20, %v292_v33 }
  0x13   :  { %v83_v48 = vmax.f32 %v82_v14, %v1294_v16  ;;  %v296_v49 = vsel %vm60_vm0, %v293_v63, %v295_v34  ;;  %v2085_v50 = vunpack.c.l.bf16 %v1308_v21  ;;  %v2080_v51 = vunpack.c.h.bf16 %v1308_v21 }
  0x14   :  { %v279_v53 = vadd.f32 %v278_v41, %v277_v32  ;;  %v298_v54 = vsel %vm60_vm0, %v295_v34, %v297_v42  ;;  %v304_v55 = vadd.f32 %v303_v43, %v296_v49  ;;  %v319_v57 = vunpack.c.l.bf16 %v1318_v36 }
  0x15   :  { %v85_v59 = vmax.f32 %v83_v48, %v84_v15  ;;  %v305_v61 = vsel %vm134_vm2, %v298_v54, 0.0  ;;  %v2079_v62 = vunpack.c.l.bf16 %v1342_v56  ;;  %v2078_v63 = vunpack.c.l.bf16 %v1327_v44 }
  0x16   :  { %v280_v2 = vrot.slane %v279_v53, 2  ;;  %v306_v6 = vadd.f32 %v305_v61, %v304_v55  ;;  %v2083_v11 = vunpack.c.l.bf16 %v1336_v52  ;;  %v2082_v22 = vunpack.c.h.bf16 %v1336_v52  ;;  %v1374_v61 = vld [vmem:[%s2075_s2 + $0xc] sm:$0x8] }
  0x17   :  { %v86_v25 = vrot.slane %v85_v59, 4  ;;  %v2081_v31 = vunpack.c.l.bf16 %v1348_v58  ;;  %v2084_v32 = vunpack.c.h.bf16 %v1342_v56  ;;  %v424_v33 = vrot.slane %v319_v57, 6 }
  0x18   :  { %v281_v14 = vadd.f32 %v280_v2, %v279_v53  ;;  %v307_v15 = vrot.slane %v306_v6, 4  ;;  %v425_v20 = vrot.slane %v2085_v50, 6  ;;  %v427_v34 = vrot.slane %v2080_v51, 6 }
  0x19   :  { %v87_v41 = vmax.f32 %v85_v59, %v86_v25  ;;  %v429_v42 = vrot.slane %v2079_v62, 6  ;;  %v431_v43 = vrot.slane %v2078_v63, 6  ;;  %v452_v48 = vrot.slane %v2081_v31, 2 }
  0x1a   :  { %v282_v49 = vrot.slane %v281_v14, 1  ;;  %v308_v54 = vadd.f32 %v307_v15, %v306_v6  ;;  %v426_v53 = vsel %vm80_vm3, %v424_v33, %v425_v20  ;;  %v428_v55 = vsel %vm80_vm3, %v425_v20, %v427_v34  ;;  %v1384_v33 = vld [vmem:[%s2075_s2 + $0x1c] sm:$0x3] }
  0x1b   :  { %v88_v59 = vrot.slane %v87_v41, 2  ;;  %v430_v2 = vsel %vm80_vm3, %v427_v34, %v429_v42  ;;  %v432_v25 = vsel %vm80_vm3, %v429_v42, %v431_v43  ;;  %v437_v63 = vadd.f32 %v428_v55, %v426_v53  ;;  %v1396_v55 = vld [vmem:[%s2076_s1 + $0x20] sm:$0xff]  }
  0x1c   :  { %v283_v62 = vadd.f32 %v282_v49, %v281_v14  ;;  %v309_v51 = vrot.slane %v308_v54, 2  ;;  %v439_v31 = vsel %vm134_vm2, %v432_v25, 0.0  ;;  %v453_v6 = vrot.slane %v2084_v32, 2  ;;  %v1405_v25 = vld [vmem:[%s2076_s1 + $0x1c] sm:$0xc] }
  0x1d   :  { %v89_v15 = vmax.f32 %v87_v41, %v88_v59  ;;  %v438_v20 = vadd.f32 %v437_v63, %v430_v2  ;;  %v455_v34 = vrot.slane %v2083_v11, 2  ;;  %v457_v42 = vrot.slane %v2082_v22, 2 }
  0x1e   :  { %v1082_v14 = vunpack.c.h.bf16 %v1210_v5  ;;  %v28_v43 = vunpack.c.l.bf16 %v1374_v61  ;;  %v310_v49 = vadd.f32 %v309_v51, %v308_v54  ;;  %v454_v53 = vsel %vm134_vm2, %v452_v48, %v453_v6 }
  0x1f   :  { %v90_v41 = vrot.slane %v89_v15, 1  ;;  %v1398_v63 = vadd.f32 %v439_v31, %v438_v20  ;;  %v456_v59 = vsel %vm134_vm2, %v453_v6, %v455_v34  ;;  %v458_v2 = vsel %vm134_vm2, %v455_v34, %v457_v42 }
  0x20   :  { %v32_v51 = vunpack.c.l.bf16 %v1384_v33  ;;  %v1409_v48 = vadd.f32 %v283_v62, %v1320_v40  ;;  %v311_v54 = vrot.slane %v310_v49, 1  ;;  %v463_v61 = vadd.f32 %v456_v59, %v454_v53 }
  0x21   :  { %v91_v22 = vmax.f32 %v89_v15, %v90_v41  ;;  %v1412_v31 = vsel %vm134_vm2, %v457_v42, 0.0  ;;  %v1170_v40 = vmov 0.0  }
  0x22   :  { %v1416_v34 = vadd.f32 %v311_v54, %v310_v49  ;;  %v1419_v32 = vadd.f32 %v463_v61, %v458_v2 }
  0x23   :  { %vm92_vm4 = vcmp.eq.f32.partialorder %v1283_v60, %v91_v22  ;;  %vm93_vm5 = vcmp.eq.f32.partialorder %v1294_v16, %v91_v22  ;;  %vm94_vm6 = vcmp.eq.f32.partialorder %v1296_v17, %v91_v22  ;;  %vm95_vm7 = vcmp.eq.f32.partialorder %v1298_v18, %v91_v22 }
  0x24   :  { %vm96_vm8 = vcmp.eq.f32.partialorder %v1292_v12, %v91_v22  ;;  %v1427_v62 = vsel %vm92_vm4, 1.0, %v1170_v40  ;;  %v1429_v15 = vsel %vm93_vm5, 1.0, %v1170_v40  ;;  %v1431_v42 = vsel %vm94_vm6, 1.0, %v1170_v40 }
  0x25   :  { %v1433_v49 = vsel %vm95_vm7, 1.0, %v1170_v40  ;;  %v1435_v53 = vsel %vm96_vm8, 1.0, %v1170_v40  ;;  %vm107_vm9 = vcmp.gt.f32.partialorder %v91_v22, 1.0  ;;  %v115_v60 = vrot.slane %v1427_v62, 4 }
  0x26   :  { %v1438_v16 = vsel %vm107_vm9, 1.0, %v1170_v40  ;;  %v116_v17 = vrot.slane %v1429_v15, 4  ;;  %v118_v12 = vrot.slane %v1431_v42, 4  ;;  %v120_v18 = vrot.slane %v1433_v49, 4 }
  0x27   :  { %v122_v41 = vrot.slane %v1435_v53, 4  ;;  %v1445_v59 = vrot.slane %v1427_v62, 6  ;;  %v144_v2 = vrot.slane %v1429_v15, 6  ;;  %v146_v54 = vrot.slane %v1431_v42, 6  ;;  %1064 = vst [vmem:[%s2077_s3 + $0x1] sm:$0x1] %v1438_v16 }
  0x28   :  { %v1454_v22 = vsel %vm60_vm0, %v115_v60, %v116_v17  ;;  %v1457_v61 = vsel %vm60_vm0, %v116_v17, %v118_v12  ;;  %v1460_v40 = vsel %vm60_vm0, %v118_v12, %v120_v18  ;;  %v148_v20 = vrot.slane %v1433_v49, 6 }
  0x29   :  { %v1464_v6 = vsel %vm60_vm0, %v120_v18, %v122_v41  ;;  %v128_v33 = vmul.f32 %v1077_v3, %v1454_v22  ;;  %v129_v60 = vmul.f32 %v1078_v7, %v1457_v61  ;;  %v130_v17 = vmul.f32 %v1460_v40, %v21_v8 }
  0x2a   :  { %v131_v12 = vmul.f32 %v1464_v6, %v22_v9  ;;  %v1480_v18 = vsel %vm80_vm3, %v1445_v59, %v144_v2  ;;  %v1483_v41 = vsel %vm80_vm3, %v144_v2, %v146_v54  ;;  %v1486_v3 = vsel %vm80_vm3, %v146_v54, %v148_v20 }
  0x2b   :  { %v132_v0 = vadd.f32 %v129_v60, %v128_v33  ;;  %v150_v7 = vrot.slane %v1435_v53, 6  ;;  %v157_v11 = vmul.f32 %v1445_v59, %v28_v43  ;;  %v158_v4 = vmul.f32 %v1081_v13, %v1480_v18 }
  0x2c   :  { %v135_v8 = vsel %vm134_vm2, %v131_v12, 0.0  ;;  %v159_v9 = vmul.f32 %v1082_v14, %v1483_v41  ;;  %v160_v2 = vmul.f32 %v1486_v3, %v31_v10  ;;  %v215_v33 = vmul.f32 %v1089_v26, %v1454_v22 }
  0x2d   :  { %v133_v54 = vadd.f32 %v132_v0, %v130_v17  ;;  %v1502_v60 = vsel %vm80_vm3, %v148_v20, %v150_v7  ;;  %v167_v43 = vrot.slane %v157_v11, 6  ;;  %v168_v50 = vrot.slane %v158_v4, 6 }
  0x2e   :  { %v161_v5 = vmul.f32 %v1502_v60, %v32_v51  ;;  %v170_v13 = vrot.slane %v159_v9, 6  ;;  %v172_v12 = vrot.slane %v160_v2, 6  ;;  %v216_v1 = vmul.f32 %v1090_v27, %v1457_v61 }
  0x2f   :  { %v136_v14 = vadd.f32 %v135_v8, %v133_v54  ;;  %v169_v10 = vsel %vm80_vm3, %v167_v43, %v168_v50  ;;  %v217_v26 = vmul.f32 %v203_v28, %v1460_v40  ;;  %v218_v11 = vmul.f32 %v204_v37, %v1464_v6 }
  0x30   :  { %v171_v20 = vsel %vm80_vm3, %v168_v50, %v170_v13  ;;  %v173_v51 = vsel %vm80_vm3, %v170_v13, %v172_v12  ;;  %v174_v17 = vrot.slane %v161_v5, 6  ;;  %v219_v0 = vadd.f32 %v216_v1, %v215_v33 }
  0x31   :  { %v137_v7 = vrot.slane %v136_v14, 4  ;;  %v180_v19 = vadd.f32 %v171_v20, %v169_v10  ;;  %v221_v27 = vsel %vm134_vm2, %v218_v11, 0.0  ;;  %v229_v4 = vmul.f32 %v1427_v62, %v210_v45 }
  0x32   :  { %v175_v28 = vsel %vm80_vm3, %v172_v12, %v174_v17  ;;  %v220_v8 = vadd.f32 %v219_v0, %v217_v26  ;;  %v230_v24 = vmul.f32 %v1429_v15, %v211_v46  ;;  %v231_v37 = vmul.f32 %v1093_v38, %v1431_v42 }
  0x33   :  { %v138_v50 = vadd.f32 %v137_v7, %v136_v14  ;;  %v181_v9 = vadd.f32 %v180_v19, %v173_v51  ;;  %v182_v2 = vsel %vm134_vm2, %v175_v28, 0.0  ;;  %v232_v29 = vmul.f32 %v1094_v39, %v1433_v49 }
  0x34   :  { %v222_v45 = vadd.f32 %v221_v27, %v220_v8  ;;  %v233_v33 = vmul.f32 %v1435_v53, %v214_v47  ;;  %v239_v23 = vrot.slane %v229_v4, 4  ;;  %v240_v54 = vrot.slane %v230_v24, 4 }
  0x35   :  { %v139_v46 = vrot.slane %v138_v50, 2  ;;  %v183_v43 = vadd.f32 %v182_v2, %v181_v9  ;;  %v242_v5 = vrot.slane %v231_v37, 4  ;;  %v244_v13 = vrot.slane %v232_v29, 4 }
  0x36   :  { %v223_v38 = vrot.slane %v222_v45, 4  ;;  %v241_v12 = vsel %vm60_vm0, %v239_v23, %v240_v54  ;;  %v246_v1 = vrot.slane %v233_v33, 4  ;;  %v1538_v14 = vadd.f32 %v1416_v34, %v1409_v48 }
  0x37   :  { %v140_v30 = vadd.f32 %v139_v46, %v138_v50  ;;  %v184_v39 = vrot.slane %v183_v43, 4  ;;  %v243_v35 = vsel %vm60_vm0, %v240_v54, %v242_v5  ;;  %v245_v47 = vsel %vm60_vm0, %v242_v5, %v244_v13 }
  0x38   :  { %v224_v10 = vadd.f32 %v223_v38, %v222_v45  ;;  %v247_v26 = vsel %vm60_vm0, %v244_v13, %v246_v1  ;;  %v252_v11 = vadd.f32 %v243_v35, %v241_v12  ;;  %v332_v20 = vmul.f32 %v319_v57, %v1445_v59 }
  0x39   :  { %v141_v51 = vrot.slane %v140_v30, 1  ;;  %v185_v17 = vadd.f32 %v184_v39, %v183_v43  ;;  %v254_v0 = vsel %vm134_vm2, %v247_v26, 0.0  ;;  %v2087_v48 = vunpack.c.l.bf16 %v1308_v21 }
  0x3a   :  { %v225_v7 = vrot.slane %v224_v10, 2  ;;  %v253_v19 = vadd.f32 %v252_v11, %v245_v47  ;;  %v2088_v27 = vunpack.c.h.bf16 %v1308_v21  ;;  %v2089_v28 = vunpack.c.l.bf16 %v1342_v56 }
  0x3b   :  { %v333_v34 = vmul.f32 %v2087_v48, %v1480_v18  ;;  %v1556_v36 = vadd.f32 %v141_v51, %v140_v30  ;;  %v186_v57 = vrot.slane %v185_v17, 2  ;;  %v2090_v24 = vunpack.c.l.bf16 %v1327_v44  ;;  %v1567_v44 = vld [vmem:[%s2076_s1 + $0x28] ss:$88 sps:$4 sm:$0xff]  }
  0x3c   :  { %v334_v4 = vmul.f32 %v2088_v27, %v1483_v41  ;;  %v335_v8 = vmul.f32 %v2089_v28, %v1486_v3  ;;  %v342_v50 = vrot.slane %v332_v20, 6  ;;  %v226_v9 = vadd.f32 %v225_v7, %v224_v10 }
  0x3d   :  { %v336_v37 = vmul.f32 %v2090_v24, %v1502_v60  ;;  %v255_v2 = vadd.f32 %v254_v0, %v253_v19  ;;  %v343_v29 = vrot.slane %v333_v34, 6  ;;  %v187_v33 = vadd.f32 %v186_v57, %v185_v17 }
  0x3e   :  { %v345_v45 = vrot.slane %v334_v4, 6  ;;  %v347_v23 = vrot.slane %v335_v8, 6  ;;  %v365_v54 = vrot.slane %v1427_v62, 2  ;;  %v227_v46 = vrot.slane %v226_v9, 1 }
  0x3f   :  { %v349_v21 = vrot.slane %v336_v37, 6  ;;  %v256_v43 = vrot.slane %v255_v2, 4  ;;  %v344_v5 = vsel %vm80_vm3, %v342_v50, %v343_v29  ;;  %v188_v38 = vrot.slane %v187_v33, 1 }
  0x40   :  { %v346_v13 = vsel %vm80_vm3, %v343_v29, %v345_v45  ;;  %v348_v12 = vsel %vm80_vm3, %v345_v45, %v347_v23  ;;  %v228_v39 = vadd.f32 %v227_v46, %v226_v9  ;;  %v366_v10 = vrot.slane %v1429_v15, 2  ;;  %v1601_v9 = vld [vmem:[%s2076_s1 + $0x2c] sm:$0x1] }
  0x41   :  { %v350_v1 = vsel %vm80_vm3, %v347_v23, %v349_v21  ;;  %v355_v30 = vadd.f32 %v346_v13, %v344_v5  ;;  %v257_v35 = vadd.f32 %v256_v43, %v255_v2  ;;  %v368_v11 = vrot.slane %v1431_v42, 2 }
  0x42   :  { %v357_v47 = vsel %vm134_vm2, %v350_v1, 0.0  ;;  %v370_v20 = vrot.slane %v1433_v49, 2  ;;  %v482_v51 = vunpack.c.l.bf16 %v1567_v44  ;;  %v262_v0 = vsub.f32 %v228_v39, %v1556_v36 }
  0x43   :  { %v356_v26 = vadd.f32 %v355_v30, %v348_v12  ;;  %v258_v17 = vrot.slane %v257_v35, 2  ;;  %v1578_v48 = vsel %vm134_vm2, %v365_v54, %v366_v10  ;;  %v372_v34 = vrot.slane %v1435_v53, 2 }
  0x44   :  { %v1582_v19 = vsel %vm134_vm2, %v366_v10, %v368_v11  ;;  %v1585_v27 = vsel %vm134_vm2, %v368_v11, %v370_v20  ;;  %v2091_v4 = vunpack.c.l.bf16 %v1348_v58  ;;  %v1590_v8 = vadd.f32 %v188_v38, %v187_v33 }
  0x45   :  { %v358_v7 = vadd.f32 %v357_v47, %v356_v26  ;;  %v259_v57 = vadd.f32 %v258_v17, %v257_v35  ;;  %v1593_v24 = vsel %vm134_vm2, %v370_v20, %v372_v34  ;;  %v2092_v37 = vunpack.c.h.bf16 %v1342_v56  ;;  %v1619_v35 = vld [vmem:[%s2076_s1 + $0x78] sm:$0xff]  }
  0x46   :  { %v378_v28 = vmul.f32 %v1578_v48, %v2091_v4  ;;  %v2093_v58 = vunpack.c.l.bf16 %v1336_v52  ;;  %v2094_v45 = vunpack.c.h.bf16 %v1336_v52  ;;  %v2095_v56 = vrot.slane %v1398_v63, 4 }
  0x47   :  { %v379_v50 = vmul.f32 %v1582_v19, %v2092_v37  ;;  %v359_v2 = vrot.slane %v358_v7, 4  ;;  %v260_v21 = vrot.slane %v259_v57, 1  ;;  %v466_v43 = vadd.f32 %v1412_v31, %v1419_v32 }
  0x48   :  { %v380_v29 = vmul.f32 %v2093_v58, %v1585_v27  ;;  %v381_v33 = vmul.f32 %v2094_v45, %v1593_v24  ;;  %v386_v23 = vrot.slane %v378_v28, 2  ;;  %v442_v46 = vadd.f32 %v2095_v56, %v1398_v63  ;;  %v1632_v58 = vld [vmem:[%s2076_s1 + $0x84] sm:$0x7] }
  0x49   :  { %v387_v54 = vrot.slane %v379_v50, 2  ;;  %v360_v5 = vadd.f32 %v359_v2, %v358_v7  ;;  %v483_v12 = vunpack.c.l.bf16 %v1601_v9  ;;  %v261_v1 = vadd.f32 %v260_v21, %v259_v57 }
  0x4a   :  { %v389_v13 = vrot.slane %v380_v29, 2  ;;  %v391_v38 = vrot.slane %v381_v33, 2  ;;  %v443_v52 = vrot.slane %v442_v46, 2  ;;  %v467_v39 = vrot.slane %v466_v43, 4 }
  0x4b   :  { %v388_v30 = vsel %vm134_vm2, %v386_v23, %v387_v54  ;;  %v264_v47 = vmul.f32 %v262_v0, %v262_v0  ;;  %v361_v63 = vrot.slane %v360_v5, 2  ;;  %v263_v31 = vsub.f32 %v261_v1, %v1590_v8 }
  0x4c   :  { %v390_v10 = vsel %vm134_vm2, %v387_v54, %v389_v13  ;;  %v392_v32 = vsel %vm134_vm2, %v389_v13, %v391_v38  ;;  %v444_v11 = vadd.f32 %v443_v52, %v442_v46  ;;  %v468_v20 = vadd.f32 %v467_v39, %v466_v43 }
  0x4d   :  { %v397_v26 = vadd.f32 %v390_v10, %v388_v30  ;;  %v362_v17 = vadd.f32 %v361_v63, %v360_v5  ;;  %v399_v34 = vsel %vm134_vm2, %v391_v38, 0.0  ;;  %v1109_v7 = vunpack.c.l.bf16 %v1619_v35 }
  0x4e   :  { %v2096_v4 = vunpack.c.l.bf16 %v1405_v25  ;;  %v265_v0 = vmul.f32 %v263_v31, %v263_v31  ;;  %v445_v37 = vrot.slane %v444_v11, 1  ;;  %v469_v50 = vrot.slane %v468_v20, 2 }
  0x4f   :  { %v398_v57 = vadd.f32 %v397_v26, %v392_v32  ;;  %v363_v2 = vrot.slane %v362_v17, 1  ;;  %v2097_v29 = vunpack.c.l.bf16 %v1396_v55  ;;  %v2098_v33 = vunpack.c.h.bf16 %v1396_v55 }
  0x50   :  { %v492_v28 = vmul.f32 %v1427_v62, %v2096_v4  ;;  %v495_v21 = vmul.f32 %v1433_v49, %v482_v51  ;;  %v1643_v54 = vadd.f32 %v265_v0, %v264_v47  ;;  %v446_v46 = vadd.f32 %v445_v37, %v444_v11 }
  0x51   :  { %v493_v45 = vmul.f32 %v2097_v29, %v1429_v15  ;;  %v494_v23 = vmul.f32 %v2098_v33, %v1431_v42  ;;  %v400_v56 = vadd.f32 %v399_v34, %v398_v57  ;;  %v470_v43 = vadd.f32 %v469_v50, %v468_v20 }
  0x52   :  { %v364_v5 = vadd.f32 %v363_v2, %v362_v17  ;;  %v496_v13 = vmul.f32 %v1435_v53, %v483_v12  ;;  %v502_v38 = vrot.slane %v492_v28, 4  ;;  %v1110_v30 = vunpack.c.h.bf16 %v1619_v35  ;;  %v1695_v35 = vld [vmem:[%s2076_s1 + $0x30] sm:$0xff]  }
  0x53   :  { %v503_v1 = vrot.slane %v493_v45, 4  ;;  %v490_v52 = vunpack.c.h.bf16 %v1567_v44  ;;  %v491_v39 = vunpack.c.l.bf16 %v1632_v58  ;;  %v401_v63 = vrot.slane %v400_v56, 4 }
  0x54   :  { %v407_v47 = vsub.f32 %v364_v5, %v1556_v36  ;;  %v447_v10 = vadd.f32 %v446_v46, %v1538_v14  ;;  %v471_v32 = vrot.slane %v470_v43, 1  ;;  %v505_v26 = vrot.slane %v494_v23, 4 }
  0x55   :  { %v504_v31 = vsel %vm60_vm0, %v502_v38, %v503_v1  ;;  %v507_v11 = vrot.slane %v495_v21, 4  ;;  %v509_v20 = vrot.slane %v496_v13, 4  ;;  %1149 = vrsqrt.f32 %v1643_v54 }
  0x56   :  { %v402_v17 = vadd.f32 %v401_v63, %v400_v56  ;;  %v472_v34 = vadd.f32 %v471_v32, %v470_v43  ;;  %v525_v4 = vmul.f32 %v1109_v7, %v1454_v22  ;;  %v506_v28 = vsel %vm60_vm0, %v503_v1, %v505_v26 }
  0x57   :  { %v508_v0 = vsel %vm60_vm0, %v505_v26, %v507_v11  ;;  %v510_v14 = vsel %vm60_vm0, %v507_v11, %v509_v20  ;;  %v526_v57 = vmul.f32 %v1110_v30, %v1457_v61  ;;  %v515_v2 = vadd.f32 %v506_v28, %v504_v31 }
  0x58   :  { %v403_v37 = vrot.slane %v402_v17, 2  ;;  %v1662_v50 = vadd.f32 %v472_v34, %v447_v10  ;;  %v517_v58 = vsel %vm134_vm2, %v510_v14, 0.0  ;;  %v527_v29 = vmul.f32 %v490_v52, %v1460_v40 }
  0x59   :  { %v528_v45 = vmul.f32 %v491_v39, %v1464_v6  ;;  %v529_v33 = vadd.f32 %v526_v57, %v525_v4  ;;  %v2099_v23 = vunpack.c.l.bf16 %v1405_v25  ;;  %v516_v46 = vadd.f32 %v515_v2, %v508_v0 }
  0x5a   :  { %v404_v56 = vadd.f32 %v403_v37, %v402_v17  ;;  %v2100_v43 = vunpack.c.l.bf16 %v1396_v55  ;;  %v2101_v13 = vunpack.c.h.bf16 %v1396_v55  ;;  %v561_v10 = vrot.slane %v482_v51, 4 }
  0x5b   :  { %v556_v21 = vrot.slane %v2099_v23, 4  ;;  %v530_v1 = vadd.f32 %v529_v33, %v527_v29  ;;  %v531_v63 = vsel %vm134_vm2, %v528_v45, 0.0  ;;  %v563_v32 = vrot.slane %v483_v12, 4  ;;  %v1690_v33 = vld [vmem:[%s2076_s1 + $0x2c] sm:$0xe] }
  0x5c   :  { %v557_v5 = vrot.slane %v2100_v43, 4  ;;  %v559_v38 = vrot.slane %v2101_v13, 4  ;;  %v405_v31 = vrot.slane %v404_v56, 1  ;;  %v518_v25 = vadd.f32 %v517_v58, %v516_v46  ;;  %v1709_v46 = vld [vmem:[%s2076_s1 + $0x84] sm:$0x8]  ;;  %v1714_v43 = vld [vmem:[%s2076_s1 + $0x88] sm:$0xff]  }
  0x5d   :  { %v532_v20 = vadd.f32 %v531_v63, %v530_v1  ;;  %v564_v55 = vsel %vm60_vm0, %v561_v10, %v563_v32  ;;  %v580_v9 = vadd.f32 %v1110_v30, %v1109_v7  ;;  %v409_v57 = vmul.f32 %v407_v47, %v407_v47 }
  0x5e   :  { %v558_v26 = vsel %vm60_vm0, %v556_v21, %v557_v5  ;;  %v560_v11 = vsel %vm60_vm0, %v557_v5, %v559_v38  ;;  %v562_v17 = vsel %vm60_vm0, %v559_v38, %v561_v10  ;;  %v406_v4 = vadd.f32 %v405_v31, %v404_v56  ;;  %v1704_v56 = vld [vmem:[%s2076_s1 + $0x38] sm:$0xff]  }
  0x5f   :  { %v569_v34 = vadd.f32 %v560_v11, %v558_v26  ;;  %v519_v28 = vrot.slane %v518_v25, 4  ;;  %v571_v44 = vsel %vm134_vm2, %v564_v55, 0.0  ;;  %v533_v51 = vrot.slane %v532_v20, 4  ;;  %v1150_v12 = vpop.eup %1149  ;;  %v1729_v26 = vld [vmem:[%s2076_s1 + $0x94] sm:$0x3] }
  0x60   :  { %v408_v14 = vsub.f32 %v406_v4, %v1590_v8  ;;  %v582_v2 = vsel %vm134_vm2, %v491_v39, 0.0  ;;  %v581_v45 = vadd.f32 %v580_v9, %v490_v52  ;;  %v272_v7 = vand.u32 2147483648, %v1643_v54 }
  0x61   :  { %v570_v0 = vadd.f32 %v569_v34, %v562_v17  ;;  %v520_v37 = vadd.f32 %v519_v28, %v518_v25  ;;  %v534_v58 = vadd.f32 %v533_v51, %v532_v20  ;;  %v1699_v23 = vmul.f32 %v1150_v12, %v1643_v54  ;;  %v1724_v25 = vld [vmem:[%s2076_s1 + $0x90] ss:$16 sps:$4 sm:$0xff]  }
  0x62   :  { %v410_v30 = vmul.f32 %v408_v14, %v408_v14  ;;  %v583_v52 = vadd.f32 %v582_v2, %v581_v45  ;;  %v1113_v38 = vunpack.c.l.bf16 %v1695_v35  ;;  %v595_v1 = vunpack.c.l.bf16 %v1690_v33 }
  0x63   :  { %v572_v29 = vadd.f32 %v571_v44, %v570_v0  ;;  %v521_v47 = vrot.slane %v520_v37, 2  ;;  %v535_v39 = vrot.slane %v534_v58, 2  ;;  %v1114_v31 = vunpack.c.h.bf16 %v1695_v35 }
  0x64   :  { %v1716_v5 = vadd.f32 %v410_v30, %v409_v57  ;;  %v584_v32 = vrot.slane %v583_v52, 4  ;;  %vm269_vm10 = vcmp.eq.f32.partialorder %v1643_v54, inf  ;;  %v2086_v11 = vunpack.c.l.bf16 %v1704_v56 }
  0x65   :  { %v573_v21 = vrot.slane %v572_v29, 4  ;;  %v522_v13 = vadd.f32 %v521_v47, %v520_v37  ;;  %v536_v63 = vadd.f32 %v535_v39, %v534_v58  ;;  %v1117_v20 = vunpack.c.l.bf16 %v1714_v43 }
  0x66   :  { %v1118_v17 = vunpack.c.h.bf16 %v1714_v43  ;;  %v604_v55 = vunpack.c.l.bf16 %v1709_v46  ;;  %v585_v44 = vadd.f32 %v584_v32, %v583_v52  ;;  %v607_v51 = vunpack.c.l.bf16 %v1724_v25 }
  0x67   :  { %v574_v10 = vadd.f32 %v573_v21, %v572_v29  ;;  %v523_v34 = vrot.slane %v522_v13, 1  ;;  %v537_v4 = vrot.slane %v536_v63, 1  ;;  %v608_v0 = vunpack.c.l.bf16 %v1729_v26  ;;  %v1836_v26 = vld [vmem:[%s2076_s1 + $0x98] sm:$0xff]  }
  0x68   :  { %v609_v9 = vmul.f32 %v595_v1, %v1578_v48  ;;  %v610_v12 = vmul.f32 %v1113_v38, %v1582_v19  ;;  %v586_v2 = vrot.slane %v585_v44, 2  ;;  %v611_v58 = vmul.f32 %v1114_v31, %v1585_v27 }
  0x69   :  { %v575_v28 = vrot.slane %v574_v10, 2  ;;  %v524_v14 = vadd.f32 %v523_v34, %v522_v13  ;;  %v538_v57 = vadd.f32 %v537_v4, %v536_v63  ;;  %v612_v29 = vmul.f32 %v2086_v11, %v1593_v24 }
  0x6a   :  { %v617_v45 = vrot.slane %v609_v9, 2  ;;  %v618_v30 = vrot.slane %v610_v12, 2  ;;  %v587_v52 = vadd.f32 %v586_v2, %v585_v44  ;;  %v620_v63 = vrot.slane %v611_v58, 2 }
  0x6b   :  { %v576_v37 = vadd.f32 %v575_v28, %v574_v10  ;;  %v539_v47 = vsub.f32 %v524_v14, %v1556_v36  ;;  %v540_v39 = vsub.f32 %v538_v57, %v1590_v8  ;;  %v622_v10 = vrot.slane %v612_v29, 2 }
  0x6c   :  { %v619_v13 = vsel %vm134_vm2, %v617_v45, %v618_v30  ;;  %v638_v32 = vmul.f32 %v604_v55, %v1445_v59  ;;  %v588_v11 = vrot.slane %v587_v52, 1  ;;  %1151 = vrsqrt.f32 %v1716_v5 }
  0x6d   :  { %v577_v21 = vrot.slane %v576_v37, 1  ;;  %v541_v34 = vmul.f32 %v539_v47, %v539_v47  ;;  %v542_v4 = vmul.f32 %v540_v39, %v540_v39  ;;  %v621_v9 = vsel %vm134_vm2, %v618_v30, %v620_v63 }
  0x6e   :  { %v623_v12 = vsel %vm134_vm2, %v620_v63, %v622_v10  ;;  %v639_v44 = vmul.f32 %v1117_v20, %v1480_v18  ;;  %v589_v2 = vadd.f32 %v588_v11, %v587_v52  ;;  %v628_v58 = vadd.f32 %v621_v9, %v619_v13 }
  0x6f   :  { %v578_v28 = vadd.f32 %v577_v21, %v576_v37  ;;  %v1762_v14 = vadd.f32 %v542_v4, %v541_v34  ;;  %v640_v37 = vmul.f32 %v1118_v17, %v1483_v41  ;;  %v641_v29 = vmul.f32 %v607_v51, %v1486_v3 }
  0x70   :  { %v642_v45 = vmul.f32 %v608_v0, %v1502_v60  ;;  %v648_v30 = vrot.slane %v638_v32, 6  ;;  %vm271_vm11 = vcmp.eq.f32.partialorder %v1643_v54, 0.0  ;;  %v630_v11 = vsel %vm134_vm2, %v622_v10, 0.0 }
  0x71   :  { %v579_v57 = vadd.f32 %v578_v28, %v1662_v50  ;;  %v270_v50 = vsel %vm269_vm10, %v1643_v54, %v1699_v23  ;;  %1153 = vrsqrt.f32 %v1762_v14  ;;  %v629_v39 = vadd.f32 %v628_v58, %v623_v12 }
  0x72   :  { %v649_v21 = vrot.slane %v639_v44, 6  ;;  %v651_v52 = vrot.slane %v640_v37, 6  ;;  %v653_v13 = vrot.slane %v641_v29, 6  ;;  %v655_v63 = vrot.slane %v642_v45, 6 }
  0x73   :  { %v1781_v47 = vadd.f32 %v589_v2, %v579_v57  ;;  %v1785_v32 = vsel %vm271_vm11, %v272_v7, %v270_v50  ;;  %v631_v34 = vadd.f32 %v630_v11, %v629_v39  ;;  %v687_v4 = vrot.slane %v595_v1, 2 }
  0x74   :  { %v650_v23 = vsel %vm80_vm3, %v648_v30, %v649_v21  ;;  %v652_v28 = vsel %vm80_vm3, %v649_v21, %v651_v52  ;;  %v654_v10 = vsel %vm80_vm3, %v651_v52, %v653_v13  ;;  %v656_v9 = vsel %vm80_vm3, %v653_v13, %v655_v63  ;;  %v1817_v52 = vld [vmem:[%s2076_s1 + $0x40] sm:$0xff]  }
  0x75   :  { %v688_v12 = vrot.slane %v1113_v38, 2  ;;  %v632_v44 = vrot.slane %v631_v34, 4  ;;  %v661_v57 = vadd.f32 %v652_v28, %v650_v23  ;;  %v663_v54 = vsel %vm134_vm2, %v656_v9, 0.0 }
  0x76   :  { %v690_v7 = vrot.slane %v1114_v31, 2  ;;  %v2102_v33 = vunpack.c.l.bf16 %v1704_v56  ;;  %v714_v58 = vrot.slane %v604_v55, 6  ;;  %v715_v37 = vrot.slane %v1117_v20, 6  ;;  %v1152_v29 = vpop.eup %1151 }
  0x77   :  { %v689_v2 = vsel %vm134_vm2, %v687_v4, %v688_v12  ;;  %v633_v38 = vadd.f32 %v632_v44, %v631_v34  ;;  %v662_v45 = vadd.f32 %v661_v57, %v654_v10  ;;  %v717_v35 = vrot.slane %v1118_v17, 6  ;;  %v1831_v57 = vld [vmem:[%s2076_s1 + $0x48] sm:$0x7] }
  0x78   :  { %v692_v1 = vrot.slane %v2102_v33, 2  ;;  %v691_v30 = vsel %vm134_vm2, %v688_v12, %v690_v7  ;;  %v716_v39 = vsel %vm80_vm3, %v714_v58, %v715_v37  ;;  %v719_v20 = vrot.slane %v607_v51, 6  ;;  %v1845_v33 = vld [vmem:[%s2076_s1 + $0x94] sm:$0xc] }
  0x79   :  { %v698_v50 = vadd.f32 %v691_v30, %v689_v2  ;;  %v634_v46 = vrot.slane %v633_v38, 2  ;;  %v664_v55 = vadd.f32 %v663_v54, %v662_v45  ;;  %v718_v21 = vsel %vm80_vm3, %v715_v37, %v717_v35 }
  0x7a   :  { %v693_v31 = vsel %vm134_vm2, %v690_v7, %v692_v1  ;;  %v700_v11 = vsel %vm134_vm2, %v692_v1, 0.0  ;;  %v417_v17 = vand.u32 2147483648, %v1716_v5  ;;  %v721_v63 = vrot.slane %v608_v0, 6 }
  0x7b   :  { %v1154_v43 = vpop.eup %1153  ;;  %v699_v13 = vadd.f32 %v698_v50, %v693_v31  ;;  %v727_v34 = vadd.f32 %v718_v21, %v716_v39  ;;  %v1823_v23 = vmul.f32 %v1152_v29, %v1716_v5  ;;  %v635_v4 = vadd.f32 %v634_v46, %v633_v38  ;;  %v1852_v38 = vld [vmem:[%s2076_s1 + $0xa4] sm:$0x1] }
  0x7c   :  { %v665_v28 = vrot.slane %v664_v55, 4  ;;  %v720_v51 = vsel %vm80_vm3, %v717_v35, %v719_v20  ;;  %v722_v9 = vsel %vm80_vm3, %v719_v20, %v721_v63  ;;  %v1121_v44 = vunpack.c.l.bf16 %v1817_v52 }
  0x7d   :  { %v701_v10 = vadd.f32 %v700_v11, %v699_v13  ;;  %v728_v12 = vadd.f32 %v727_v34, %v720_v51  ;;  %v1839_v0 = vmul.f32 %v1154_v43, %v1762_v14  ;;  %v636_v54 = vrot.slane %v635_v4, 1 }
  0x7e   :  { %v666_v7 = vadd.f32 %v665_v28, %v664_v55  ;;  %v729_v2 = vsel %vm134_vm2, %v722_v9, 0.0  ;;  %v1122_v37 = vunpack.c.h.bf16 %v1817_v52  ;;  %v742_v29 = vunpack.c.h.bf16 %v1704_v56  ;;  %v1923_v52 = vld [vmem:[%s2076_s1 + $0x48] sm:$0x8] }
  0x7f   :  { %v702_v1 = vrot.slane %v701_v10, 4  ;;  %v730_v58 = vadd.f32 %v729_v2, %v728_v12  ;;  %v637_v45 = vadd.f32 %v636_v54, %v635_v4  ;;  %v745_v35 = vunpack.c.l.bf16 %v1831_v57  ;;  %v1928_v57 = vld [vmem:[%s2076_s1 + $0x50] sm:$0xff]  }
  0x80   :  { %v667_v30 = vrot.slane %v666_v7, 2  ;;  %v1125_v31 = vunpack.c.l.bf16 %v1836_v26  ;;  %v1126_v39 = vunpack.c.h.bf16 %v1836_v26  ;;  %v751_v46 = vunpack.c.l.bf16 %v1845_v33 }
  0x81   :  { %v703_v50 = vadd.f32 %v702_v1, %v701_v10  ;;  %v731_v11 = vrot.slane %v730_v58, 4  ;;  %v671_v56 = vsub.f32 %v637_v45, %v1556_v36  ;;  %v754_v21 = vunpack.c.h.bf16 %v1724_v25 }
  0x82   :  { %v668_v55 = vadd.f32 %v667_v30, %v666_v7  ;;  %v755_v20 = vunpack.c.l.bf16 %v1852_v38  ;;  %vm414_vm12 = vcmp.eq.f32.partialorder %v1716_v5, inf  ;;  %vm546_vm13 = vcmp.eq.f32.partialorder %v1762_v14, inf  ;;  %v1937_v38 = vld [vmem:[%s2076_s1 + $0x4c] ss:$100 sps:$4 sm:$0xff]  }
  0x83   :  { %v704_v43 = vrot.slane %v703_v50, 2  ;;  %v732_v13 = vadd.f32 %v731_v11, %v730_v58  ;;  %v756_v63 = vmul.f32 %v742_v29, %v1454_v22  ;;  %v757_v34 = vmul.f32 %v1121_v44, %v1457_v61 }
  0x84   :  { %v669_v4 = vrot.slane %v668_v55, 1  ;;  %v673_v28 = vmul.f32 %v671_v56, %v671_v56  ;;  %v758_v25 = vmul.f32 %v1122_v37, %v1460_v40  ;;  %v759_v51 = vmul.f32 %v745_v35, %v1464_v6 }
  0x85   :  { %v705_v10 = vadd.f32 %v704_v43, %v703_v50  ;;  %v733_v9 = vrot.slane %v732_v13, 2  ;;  %v760_v12 = vadd.f32 %v757_v34, %v756_v63  ;;  %v770_v54 = vmul.f32 %v1427_v62, %v751_v46 }
  0x86   :  { %v670_v22 = vadd.f32 %v669_v4, %v668_v55  ;;  %v762_v7 = vsel %vm134_vm2, %v759_v51, 0.0  ;;  %v771_v61 = vmul.f32 %v1125_v31, %v1429_v15  ;;  %v772_v2 = vmul.f32 %v1126_v39, %v1431_v42 }
  0x87   :  { %v706_v33 = vrot.slane %v705_v10, 1  ;;  %v734_v40 = vadd.f32 %v733_v9, %v732_v13  ;;  %v761_v1 = vadd.f32 %v760_v12, %v758_v25  ;;  %v773_v58 = vmul.f32 %v1433_v49, %v754_v21 }
  0x88   :  { %v672_v6 = vsub.f32 %v670_v22, %v1590_v8  ;;  %v774_v62 = vmul.f32 %v1435_v53, %v755_v20  ;;  %v780_v45 = vrot.slane %v770_v54, 4  ;;  %v781_v30 = vrot.slane %v771_v61, 4 }
  0x89   :  { %v707_v50 = vadd.f32 %v706_v33, %v705_v10  ;;  %v735_v11 = vrot.slane %v734_v40, 1  ;;  %v763_v55 = vadd.f32 %v762_v7, %v761_v1  ;;  %v783_v56 = vrot.slane %v772_v2, 4 }
  0x8a   :  { %v674_v15 = vmul.f32 %v672_v6, %v672_v6  ;;  %v782_v42 = vsel %vm60_vm0, %v780_v45, %v781_v30  ;;  %v785_v43 = vrot.slane %v773_v58, 4  ;;  %v787_v13 = vrot.slane %v774_v62, 4  ;;  %v1943_v45 = vld [vmem:[%s2076_s1 + $0x58] sm:$0x3] }
  0x8b   :  { %v708_v63 = vadd.f32 %v707_v50, %v1781_v47  ;;  %v736_v49 = vadd.f32 %v735_v11, %v734_v40  ;;  %v764_v34 = vrot.slane %v763_v55, 4  ;;  %v784_v4 = vsel %vm60_vm0, %v781_v30, %v783_v56  ;;  %v1948_v30 = vld [vmem:[%s2076_s1 + $0xa8] sm:$0xff]  }
  0x8c   :  { %v1887_v25 = vadd.f32 %v674_v15, %v673_v28  ;;  %v786_v53 = vsel %vm60_vm0, %v783_v56, %v785_v43  ;;  %v788_v51 = vsel %vm60_vm0, %v785_v43, %v787_v13  ;;  %v793_v10 = vadd.f32 %v784_v4, %v782_v42 }
  0x8d   :  { %v549_v9 = vand.u32 2147483648, %v1762_v14  ;;  %v1892_v12 = vadd.f32 %v736_v49, %v708_v63  ;;  %v765_v54 = vadd.f32 %v764_v34, %v763_v55  ;;  %v815_v22 = vadd.f32 %v1121_v44, %v742_v29  ;;  %v1957_v63 = vld [vmem:[%s2076_s1 + $0xa4] sm:$0xe] }
  0x8e   :  { %v1900_v47 = vsel %vm414_vm12, %v1716_v5, %v1823_v23  ;;  %v1906_v28 = vsel %vm546_vm13, %v1762_v14, %v1839_v0  ;;  %1155 = vrsqrt.f32 %v1887_v25  ;;  %v795_v7 = vsel %vm134_vm2, %v788_v51, 0.0 }
  0x8f   :  { %v766_v61 = vrot.slane %v765_v54, 2  ;;  %v794_v2 = vadd.f32 %v793_v10, %v786_v53  ;;  %v816_v44 = vadd.f32 %v1122_v37, %v815_v22  ;;  %v817_v23 = vsel %vm134_vm2, %v745_v35, 0.0 }
  0x90   :  { %v831_v29 = vrot.slane %v751_v46, 4  ;;  %v832_v33 = vrot.slane %v1125_v31, 4  ;;  %v834_v40 = vrot.slane %v1126_v39, 4  ;;  %v836_v0 = vrot.slane %v754_v21, 4 }
  0x91   :  { %vm678_vm14 = vcmp.eq.f32.partialorder %v1887_v25, inf  ;;  %v767_v1 = vadd.f32 %v766_v61, %v765_v54  ;;  %v796_v58 = vadd.f32 %v795_v7, %v794_v2  ;;  %v818_v6 = vadd.f32 %v817_v23, %v816_v44 }
  0x92   :  { %v838_v62 = vrot.slane %v755_v20, 4  ;;  %v681_v26 = vand.u32 2147483648, %v1887_v25  ;;  %v833_v37 = vsel %vm60_vm0, %v831_v29, %v832_v33  ;;  %v835_v35 = vsel %vm60_vm0, %v832_v33, %v834_v40 }
  0x93   :  { %v837_v31 = vsel %vm60_vm0, %v834_v40, %v836_v0  ;;  %v768_v39 = vrot.slane %v767_v1, 1  ;;  %v797_v46 = vrot.slane %v796_v58, 4  ;;  %v819_v21 = vrot.slane %v818_v6, 4 }
  0x94   :  { %v839_v20 = vsel %vm60_vm0, %v836_v0, %v838_v62  ;;  %v844_v50 = vadd.f32 %v835_v35, %v833_v37  ;;  %v1129_v55 = vunpack.c.l.bf16 %v1928_v57  ;;  %v860_v56 = vunpack.c.l.bf16 %v1923_v52 }
  0x95   :  { %v846_v11 = vsel %vm134_vm2, %v839_v20, 0.0  ;;  %v769_v15 = vadd.f32 %v768_v39, %v767_v1  ;;  %v798_v42 = vadd.f32 %v797_v46, %v796_v58  ;;  %v820_v43 = vadd.f32 %v819_v21, %v818_v6 }
  0x96   :  { %v861_v13 = vunpack.c.l.bf16 %v1937_v38  ;;  %v845_v49 = vadd.f32 %v844_v50, %v837_v31  ;;  %v1130_v34 = vunpack.c.h.bf16 %v1928_v57  ;;  %v864_v4 = vunpack.c.l.bf16 %v1943_v45 }
  0x97   :  { %v1133_v53 = vunpack.c.l.bf16 %v1948_v30  ;;  %v799_v51 = vrot.slane %v798_v42, 2  ;;  %v803_v10 = vsub.f32 %v769_v15, %v1556_v36  ;;  %v821_v54 = vrot.slane %v820_v43, 2 }
  0x98   :  { %v1134_v22 = vunpack.c.h.bf16 %v1948_v30  ;;  %v1156_v7 = vpop.eup %1155  ;;  %v847_v61 = vadd.f32 %v846_v11, %v845_v49  ;;  %v869_v2 = vunpack.c.l.bf16 %v1957_v63  ;;  %v873_v44 = vmul.f32 %v860_v56, %v1445_v59 }
  0x99   :  { %v874_v23 = vmul.f32 %v861_v13, %v1480_v18  ;;  %v677_v29 = vmul.f32 %v1156_v7, %v1887_v25  ;;  %v800_v33 = vadd.f32 %v799_v51, %v798_v42  ;;  %v822_v40 = vadd.f32 %v821_v54, %v820_v43 }
  0x9a   :  { %v872_v0 = vunpack.c.h.bf16 %v1937_v38  ;;  %vm416_vm15 = vcmp.eq.f32.partialorder %v1716_v5, 0.0  ;;  %vm548_vm1 = vcmp.eq.f32.partialorder %v1762_v14, 0.0  ;;  %vm680_vm4 = vcmp.eq.f32.partialorder %v1887_v25, 0.0 }
  0x9b   :  { %v848_v1 = vrot.slane %v847_v61, 4  ;;  %v875_v58 = vmul.f32 %v1129_v55, %v1483_v41  ;;  %v876_v59 = vmul.f32 %v1130_v34, %v1486_v3  ;;  %v877_v18 = vmul.f32 %v864_v4, %v1502_v60 }
  0x9c   :  { %v801_v6 = vrot.slane %v800_v33, 1  ;;  %v805_v62 = vmul.f32 %v803_v10, %v803_v10  ;;  %v823_v52 = vrot.slane %v822_v40, 1  ;;  %v883_v37 = vrot.slane %v873_v44, 6 }
  0x9d   :  { %v679_v35 = vsel %vm678_vm14, %v1887_v25, %v677_v29  ;;  %v849_v31 = vadd.f32 %v848_v1, %v847_v61  ;;  %v884_v39 = vrot.slane %v874_v23, 6  ;;  %v886_v46 = vrot.slane %v875_v58, 6 }
  0x9e   :  { %v802_v41 = vadd.f32 %v801_v6, %v800_v33  ;;  %v824_v21 = vadd.f32 %v823_v52, %v822_v40  ;;  %v888_v20 = vrot.slane %v876_v59, 6  ;;  %v890_v50 = vrot.slane %v877_v18, 6 }
  0x9f   :  { %v850_v3 = vrot.slane %v849_v31, 2  ;;  %v885_v11 = vsel %vm80_vm3, %v883_v37, %v884_v39  ;;  %v887_v60 = vsel %vm80_vm3, %v884_v39, %v886_v46  ;;  %v906_v15 = vmul.f32 %v869_v2, %v1578_v48 }
  0xa0   :  { %v804_v42 = vsub.f32 %v802_v41, %v1590_v8  ;;  %v825_v43 = vadd.f32 %v824_v21, %v1892_v12  ;;  %v889_v49 = vsel %vm80_vm3, %v886_v46, %v888_v20  ;;  %v891_v51 = vsel %vm80_vm3, %v888_v20, %v890_v50 }
  0xa1   :  { %v851_v10 = vadd.f32 %v850_v3, %v849_v31  ;;  %v896_v54 = vadd.f32 %v887_v60, %v885_v11  ;;  %v898_v7 = vsel %vm134_vm2, %v891_v51, 0.0  ;;  %v907_v61 = vmul.f32 %v1133_v53, %v1582_v19 }
  0xa2   :  { %v806_v44 = vmul.f32 %v804_v42, %v804_v42  ;;  %v908_v48 = vmul.f32 %v1134_v22, %v1585_v27  ;;  %v909_v12 = vmul.f32 %v872_v0, %v1593_v24  ;;  %v914_v23 = vrot.slane %v906_v15, 2 }
  0xa3   :  { %v852_v29 = vrot.slane %v851_v10, 1  ;;  %v897_v33 = vadd.f32 %v896_v54, %v889_v49  ;;  %v915_v40 = vrot.slane %v907_v61, 2  ;;  %v952_v1 = vrot.slane %v860_v56, 6 }
  0xa4   :  { %v2003_v58 = vadd.f32 %v806_v44, %v805_v62  ;;  %v917_v59 = vrot.slane %v908_v48, 2  ;;  %v919_v18 = vrot.slane %v909_v12, 2  ;;  %v953_v6 = vrot.slane %v861_v13, 6 }
  0xa5   :  { %v853_v19 = vadd.f32 %v852_v29, %v851_v10  ;;  %v899_v52 = vadd.f32 %v898_v7, %v897_v33  ;;  %v916_v37 = vsel %vm134_vm2, %v914_v23, %v915_v40  ;;  %v955_v27 = vrot.slane %v1129_v55, 6 }
  0xa6   :  { %v418_v24 = vsel %vm416_vm15, %v417_v17, %v1900_v47  ;;  %v550_v56 = vsel %vm548_vm1, %v549_v9, %v1906_v28  ;;  %v682_v13 = vsel %vm680_vm4, %v681_v26, %v679_v35  ;;  %1157 = vrsqrt.f32 %v2003_v58 }
  0xa7   :  { %v2023_v55 = vadd.f32 %v853_v19, %v825_v43  ;;  %v900_v62 = vrot.slane %v899_v52, 4  ;;  %v918_v31 = vsel %vm134_vm2, %v915_v40, %v917_v59  ;;  %v920_v5 = vsel %vm134_vm2, %v917_v59, %v919_v18 }
  0xa8   :  { %vm810_vm5 = vcmp.eq.f32.partialorder %v2003_v58, inf  ;;  %v925_v17 = vadd.f32 %v918_v31, %v916_v37  ;;  %v927_v14 = vsel %vm134_vm2, %v919_v18, 0.0  ;;  %v954_v9 = vsel %vm80_vm3, %v952_v1, %v953_v6 }
  0xa9   :  { %v956_v47 = vsel %vm80_vm3, %v953_v6, %v955_v27  ;;  %v901_v25 = vadd.f32 %v900_v62, %v899_v52  ;;  %v957_v28 = vrot.slane %v1130_v34, 6  ;;  %v959_v26 = vrot.slane %v864_v4, 6 }
  0xaa   :  { %v965_v35 = vadd.f32 %v956_v47, %v954_v9  ;;  %v926_v39 = vadd.f32 %v925_v17, %v920_v5  ;;  %v980_v46 = vrot.slane %v869_v2, 2  ;;  %v981_v41 = vrot.slane %v1133_v53, 2 }
  0xab   :  { %v983_v21 = vrot.slane %v1134_v22, 2  ;;  %v902_v20 = vrot.slane %v901_v25, 2  ;;  %v958_v50 = vsel %vm80_vm3, %v955_v27, %v957_v28  ;;  %v960_v57 = vsel %vm80_vm3, %v957_v28, %v959_v26 }
  0xac   :  { %v985_v45 = vrot.slane %v872_v0, 2  ;;  %v928_v34 = vadd.f32 %v927_v14, %v926_v39  ;;  %v966_v4 = vadd.f32 %v965_v35, %v958_v50  ;;  %v967_v3 = vsel %vm134_vm2, %v960_v57, 0.0 }
  0xad   :  { %v982_v63 = vsel %vm134_vm2, %v980_v46, %v981_v41  ;;  %v813_v2 = vand.u32 2147483648, %v2003_v58  ;;  %v903_v53 = vadd.f32 %v902_v20, %v901_v25  ;;  %v984_v30 = vsel %vm134_vm2, %v981_v41, %v983_v21 }
  0xae   :  { %v986_v22 = vsel %vm134_vm2, %v983_v21, %v985_v45  ;;  %v929_v11 = vrot.slane %v928_v34, 4  ;;  %v968_v60 = vadd.f32 %v967_v3, %v966_v4  ;;  %v991_v15 = vadd.f32 %v984_v30, %v982_v63 }
  0xaf   :  { %vm1002_vm6 = vcmask 1040384   ;;  %v904_v42 = vrot.slane %v903_v53, 1  ;;  %v993_v38 = vsel %vm134_vm2, %v985_v45, 0.0  ;;  %vm1005_vm7 = vcmask 1042432  }
  0xb0   :  { %v1003_v0 = vsel %vm1002_vm6, %v1785_v32, %v418_v24  ;;  %v1158_v43 = vpop.eup %1157  ;;  %v930_v49 = vadd.f32 %v929_v11, %v928_v34  ;;  %v969_v51 = vrot.slane %v968_v60, 4  ;;  %v992_v10 = vadd.f32 %v991_v15, %v986_v22 }
  0xb1   :  { %v1004_v54 = vsel %vm80_vm3, %v1003_v0, %v550_v56  ;;  %v809_v7 = vmul.f32 %v1158_v43, %v2003_v58  ;;  %vm812_vm8 = vcmp.eq.f32.partialorder %v2003_v58, 0.0  ;;  %v905_v61 = vadd.f32 %v904_v42, %v903_v53  ;;  %v1169_v56 = vld [vmem:[%s2074_s0] sm:$0x3f] }
  0xb2   :  { %v1006_v44 = vsel %vm1005_vm7, %v1004_v54, %v682_v13  ;;  %v931_v48 = vrot.slane %v930_v49, 2  ;;  %v970_v12 = vadd.f32 %v969_v51, %v968_v60  ;;  %v994_v23 = vadd.f32 %v993_v38, %v992_v10 }
  0xb3   :  { %v811_v32 = vsel %vm810_vm5, %v2003_v58, %v809_v7  ;;  %v935_v29 = vsub.f32 %v905_v61, %v1556_v36  ;;  %v1030_v58 = vsel %vm134_vm2, %v1169_v56, -inf  ;;  %vm1008_vm9 = vcmask 1044480  }
  0xb4   :  { %v814_v33 = vsel %vm812_vm8, %v813_v2, %v811_v32  ;;  %v932_v40 = vadd.f32 %v931_v48, %v930_v49  ;;  %v971_v1 = vrot.slane %v970_v12, 2  ;;  %v995_v59 = vrot.slane %v994_v23, 4 }
  0xb5   :  { %v1007_v18 = vsel %vm60_vm0, %v1006_v44, %v814_v33  ;;  %v937_v13 = vmul.f32 %v935_v29, %v935_v29  ;;  %v1031_v9 = vrot.slane %v1030_v58, 4 }
  0xb6   :  { %v933_v6 = vrot.slane %v932_v40, 1  ;;  %v972_v19 = vadd.f32 %v971_v1, %v970_v12  ;;  %v996_v52 = vadd.f32 %v995_v59, %v994_v23 }
  0xb7   :  { %v1032_v28 = vmax.f32 %v1030_v58, %v1031_v9 }
  0xb8   :  { %v934_v37 = vadd.f32 %v933_v6, %v932_v40  ;;  %v973_v27 = vrot.slane %v972_v19, 1  ;;  %v997_v24 = vrot.slane %v996_v52, 2 }
  0xb9   :  { %v1033_v35 = vrot.slane %v1032_v28, 2 }
  0xba   :  { %v936_v36 = vsub.f32 %v934_v37, %v1590_v8  ;;  %v974_v62 = vadd.f32 %v973_v27, %v972_v19  ;;  %v998_v31 = vadd.f32 %v997_v24, %v996_v52 }
  0xbb   :  { %v1034_v39 = vmax.f32 %v1032_v28, %v1033_v35 }
  0xbc   :  { %v938_v5 = vmul.f32 %v936_v36, %v936_v36  ;;  %v975_v17 = vadd.f32 %v974_v62, %v2023_v55  ;;  %v999_v14 = vrot.slane %v998_v31, 1 }
  0xbd   :  { %v1035_v8 = vrot.slane %v1034_v39, 1 }
  0xbe   :  { %v939_v47 = vadd.f32 %v938_v5, %v937_v13  ;;  %v1000_v25 = vadd.f32 %v999_v14, %v998_v31 }
  0xbf   :  { %v1036_v45 = vmax.f32 %v1034_v39, %v1035_v8 }
  0xc0   :  { %1159 = vrsqrt.f32 %v939_v47  ;;  %v1001_v26 = vadd.f32 %v1000_v25, %v975_v17  ;;  %vm942_vm0 = vcmp.eq.f32.partialorder %v939_v47, inf  ;;  %v945_v41 = vand.u32 2147483648, %v939_v47 }
  0xc1   :  { %vm944_vm3 = vcmp.eq.f32.partialorder %v939_v47, 0.0  ;;  %v1037_v3 = vsub.f32 %v1169_v56, %v1036_v45 }
  0xc2   :  { %v1061_v31 = vmul.f32 0.0, %v1001_v26 }
  0xc3   :  { %v1038_v53 = vmul.f32 1.442695, %v1037_v3 }
  0xc5   :  { %1161 = vpow2.f32 %v1038_v53 }
  0xca   :  { %v1160_v46 = vpop.eup %1159 }
  0xcb   :  { %v941_v21 = vmul.f32 %v1160_v46, %v939_v47 }
  0xcd   :  { %v943_v20 = vsel %vm942_vm0, %v939_v47, %v941_v21 }
  0xce   :  { %v946_v50 = vsel %vm944_vm3, %v945_v41, %v943_v20 }
  0xcf   :  { %v1009_v57 = vsel %vm1008_vm9, %v1007_v18, %v946_v50  ;;  %v1162_v42 = vpop.eup %1161 }
  0xd0   :  { %v1010_v55 = vmul.f32 -5.0, %v1009_v57  ;;  %v1040_v38 = vsel %vm134_vm2, %v1162_v42, 0.0 }
  0xd1   :  { %v1041_v0 = vrot.slane %v1040_v38, 4 }
  0xd2   :  { %v1011_v34 = vsel %vm134_vm2, %v1010_v55, -inf }
  0xd3   :  { %v1012_v4 = vrot.slane %v1011_v34, 4  ;;  %v1042_v10 = vadd.f32 %v1041_v0, %v1040_v38 }
  0xd5   :  { %v1013_v63 = vmax.f32 %v1011_v34, %v1012_v4  ;;  %v1043_v61 = vrot.slane %v1042_v10, 2 }
  0xd7   :  { %v1014_v2 = vrot.slane %v1013_v63, 2  ;;  %v1044_v12 = vadd.f32 %v1043_v61, %v1042_v10 }
  0xd9   :  { %v1015_v30 = vmax.f32 %v1013_v63, %v1014_v2  ;;  %v1045_v32 = vrot.slane %v1044_v12, 1 }
  0xdb   :  { %v1016_v22 = vrot.slane %v1015_v30, 1  ;;  %v1046_v29 = vadd.f32 %v1045_v32, %v1044_v12 }
  0xdd   :  { %v1017_v11 = vmax.f32 %v1015_v30, %v1016_v22 }
  0xdf   :  { %v1018_v60 = vsub.f32 %v1010_v55, %v1017_v11 }
  0xe1   :  { %v1019_v15 = vmul.f32 1.442695, %v1018_v60 }
  0xe3   :  { %1163 = vpow2.f32 %v1019_v15 }
  0xed   :  { %v1164_v43 = vpop.eup %1163 }
  0xee   :  { %v1021_v49 = vsel %vm134_vm2, %v1164_v43, 0.0 }
  0xef   :  { %v1022_v51 = vrot.slane %v1021_v49, 4 }
  0xf1   :  { %v1023_v54 = vadd.f32 %v1022_v51, %v1021_v49 }
  0xf3   :  { %v1024_v7 = vrot.slane %v1023_v54, 2 }
  0xf5   :  { %v1025_v44 = vadd.f32 %v1024_v7, %v1023_v54 }
  0xf7   :  { %v1026_v48 = vrot.slane %v1025_v44, 1 }
  0xf9   :  { %v1027_v23 = vadd.f32 %v1026_v48, %v1025_v44 }
  0xfb   :  { %1165 = vrcp.f32 %v1027_v23 }
  0xfc   :  { %1167 = vlog2.f32 %v1046_v29 }
 0x105   :  { %v1166_v33 = vpop.eup %1165 }
 0x106   :  { %v1029_v40 = vmul.f32 %v1166_v33, %v1164_v43  ;;  %v1168_v19 = vpop.eup %1167 }
 0x107   :  { %v1048_v37 = vmul.f32 0.6931472, %v1168_v19 }
 0x108   :  { %v1050_v1 = vmul.f32 %v1169_v56, %v1029_v40 }
 0x109   :  { %v1049_v58 = vadd.f32 %v1048_v37, %v1036_v45 }
 0x10a   :  { %v1051_v59 = vsel %vm134_vm2, %v1050_v1, 0.0 }
 0x10b   :  { %v1052_v18 = vrot.slane %v1051_v59, 4 }
 0x10d   :  { %v1053_v6 = vadd.f32 %v1052_v18, %v1051_v59 }
 0x10f   :  { %v1054_v52 = vrot.slane %v1053_v6, 2 }
 0x111   :  { %v1055_v27 = vadd.f32 %v1054_v52, %v1053_v6 }
 0x113   :  { %v1056_v24 = vrot.slane %v1055_v27, 1 }
 0x115   :  { %v1057_v36 = vadd.f32 %v1056_v24, %v1055_v27 }
 0x117   :  { %v1058_v13 = vsub.f32 0.0, %v1057_v36 }
 0x119   :  { %v1059_v62 = vadd.f32 %v1058_v13, %v1049_v58 }
 0x11b   :  { %v1060_v5 = vmul.f32 %v1438_v16, %v1059_v62 }
 0x11d   :  { %v1062_v17 = vadd.f32 %v1061_v31, %v1060_v5 }
 0x11f   :  { %1063 = vst [vmem:[%s2077_s3] sm:$0x1] %v1062_v17 }

</bundles_post_ra>
